<compile_context>
chip_gen: v7x
topology: tpu7x:2x2x1
jax: 0.10.0
libtpu: 0.0.40
codegen_flags: <defaults>
</compile_context>

<pallas_src>
import jax
import jax.numpy as jnp
from jax.experimental import pallas as pl
from jax.experimental.pallas import tpu as pltpu

INPUTS_COUNT = 768
HIDDEN0 = 1024
HIDDEN1 = 256
OUTPUTS_COUNT = 10
OUT_PAD = 128          # lane-dense padded output width


def _round_up(x, m):
    return ((x + m - 1) // m) * m


def _default_max_tile_b():
    # v5e: MXU passes are 128-wide -> tile_b=128 already fills a pass; larger tiles
    # only add h0/h1 spill traffic through its single vst slot.
    # v6e / v7x: MXU passes are 256-wide -> tile_b=256 amortizes the stationary-RHS
    # push and halves the ~0.35 us per-grid-step overhead.
    try:
        kind = jax.devices()[0].device_kind.lower()
    except Exception:
        return 256
    if "v5 lite" in kind or "v5e" in kind or "v5litepod" in kind:
        return 128
    return 256


def _pick_tiling(batch, max_tile_b):
    """Pick (tile_b, padded_batch).

    Prefers tiles that (a) divide the batch exactly (avoids a wrapper-side jnp.pad
    of x, which would cost a full extra HBM read+write pass), (b) are multiples of
    16 (bf16 sublane packing), and (c) give >= 2 grid steps when the batch is big
    enough so the 'parallel' axis can shard across v7x's two TensorCores.
    """
    if batch <= max_tile_b:
        if batch >= 32 and batch % 32 == 0:
            return batch // 2, batch        # two tiles -> both v7x TCs busy
        return batch, batch                 # single full-dim block, no padding
    t = (max_tile_b // 16) * 16
    while t >= 16:
        if batch % t == 0:
            return t, batch                 # clean divisor -> no padding needed
        t -= 16
    tile_b = (max_tile_b // 16) * 16        # no clean divisor: pad the batch up
    return tile_b, _round_up(batch, tile_b)


def mlp_kernel(x_ref, w0_ref, b0_ref, w1_ref, b1_ref, w2_ref, b2_ref, o_ref):
    # Layer 0: Linear(768 -> 1024) + ReLU. x arrives bf16; f32 accumulate on MXU.
    h0 = jnp.dot(x_ref[...], w0_ref[...], preferred_element_type=jnp.float32)
    h0 = jnp.maximum(h0 + b0_ref[...], 0.0)

    # Layer 1: Linear(1024 -> 256) + ReLU.
    h1 = jnp.dot(h0.astype(jnp.bfloat16), w1_ref[...],
                 preferred_element_type=jnp.float32)
    h1 = jnp.maximum(h1 + b1_ref[...], 0.0)

    # Layer 2: Linear(256 -> 10), zero-padded to 128 lanes (lane-dense store).
    out = jnp.dot(h1.astype(jnp.bfloat16), w2_ref[...],
                  preferred_element_type=jnp.float32)
    o_ref[...] = (out + b2_ref[...]).astype(o_ref.dtype)


def mlp_forward(x, w0, b0, w1, b1, w2p, b2p, *, max_tile_b=None):
    if x.dtype != jnp.bfloat16:
        # Producers should emit bf16 directly (halves x HBM traffic). This cast is
        # only a fallback so f32 callers still work.
        x = x.astype(jnp.bfloat16)

    B = x.shape[0]
    if max_tile_b is None:
        max_tile_b = _default_max_tile_b()
    tile_b, b_pad = _pick_tiling(B, max_tile_b)
    if b_pad != B:
        x = jnp.pad(x, ((0, b_pad - B), (0, 0)))
    n_tiles = b_pad // tile_b

    # Weights / biases stay VMEM-resident across all batch tiles (constant index
    # map) and single-buffered: constants never need a double buffer.
    def resident(shape):
        return pl.BlockSpec(shape, lambda i: (0, 0), pipeline_mode=pl.Buffered(1))

    flops = 2 * b_pad * (INPUTS_COUNT * HIDDEN0 + HIDDEN0 * HIDDEN1
                         + HIDDEN1 * OUT_PAD)
    bytes_accessed = (
        (w0.size + w1.size + w2p.size) * 2      # bf16 weights
        + (b0.size + b1.size + b2p.size) * 4    # f32 biases
        + b_pad * INPUTS_COUNT * 2              # bf16 input
        + b_pad * OUT_PAD * 4                   # f32 output
    )

    out = pl.pallas_call(
        mlp_kernel,
        out_shape=jax.ShapeDtypeStruct((b_pad, OUT_PAD), jnp.float32),
        grid=(n_tiles,),
        in_specs=[
            pl.BlockSpec((tile_b, INPUTS_COUNT), lambda i: (i, 0)),   # x tile
            resident(w0.shape), resident(b0.shape),
            resident(w1.shape), resident(b1.shape),
            resident(w2p.shape), resident(b2p.shape),
        ],
        out_specs=pl.BlockSpec((tile_b, OUT_PAD), lambda i: (i, 0)),
        compiler_params=pltpu.CompilerParams(
            dimension_semantics=("parallel",),
            vmem_limit_bytes=(32 if tile_b > 128 else 16) * 1024 * 1024,
        ),
        cost_estimate=pl.CostEstimate(
            flops=flops, transcendentals=0, bytes_accessed=bytes_accessed),
    )(x, w0, b0, w1, b1, w2p, b2p)

    # TODO(synk): let downstream consumers read the padded (b_pad, 128) buffer
    # directly (and/or emit bf16 output) to skip this extra XLA slice pass.
    return out[:B, :OUTPUTS_COUNT]


def init_params(key):
    # One-time parameter prep (mirrors nn.Linear's U(-1/sqrt(in), 1/sqrt(in)) init):
    #  * weights in (in_features, out_features) layout, stored bf16 (halves weight
    #    DMA bytes, native MXU bf16 rate); biases stay f32 shaped (1, out)
    #  * last layer zero-padded 10 -> 128 outputs here, not per forward call
    # TODO(synk): optional int8 weights (v5e/v6e) / fp8-e4m3 weights (v7x, no int
    # MXU path) with per-channel scales folded into the bias add for another ~2x
    # cut of weight DMA in the small-batch, weight-bound regime.
    def linear(key, fan_in, fan_out, pad_to=None):
        kw, kb = jax.random.split(key)
        bound = 1.0 / jnp.sqrt(fan_in)
        w = jax.random.uniform(kw, (fan_in, fan_out), jnp.float32, -bound, bound)
        b = jax.random.uniform(kb, (1, fan_out), jnp.float32, -bound, bound)
        if pad_to is not None:
            w = jnp.pad(w, ((0, 0), (0, pad_to - fan_out)))
            b = jnp.pad(b, ((0, 0), (0, pad_to - fan_out)))
        return w.astype(jnp.bfloat16), b

    k0, k1, k2 = jax.random.split(key, 3)
    w0, b0 = linear(k0, INPUTS_COUNT, HIDDEN0)
    w1, b1 = linear(k1, HIDDEN0, HIDDEN1)
    w2p, b2p = linear(k2, HIDDEN1, OUTPUTS_COUNT, pad_to=OUT_PAD)
    return w0, b0, w1, b1, w2p, b2p


def reference(x, w0, b0, w1, b1, w2p, b2p):
    # Same math / same bf16 casts as the kernel, in plain JAX.
    xb = x.astype(jnp.bfloat16)
    h0 = jnp.maximum(
        jnp.dot(xb, w0, preferred_element_type=jnp.float32) + b0, 0.0)
    h1 = jnp.maximum(
        jnp.dot(h0.astype(jnp.bfloat16), w1,
                preferred_element_type=jnp.float32) + b1, 0.0)
    out = jnp.dot(h1.astype(jnp.bfloat16), w2p,
                  preferred_element_type=jnp.float32) + b2p
    return out[:, :OUTPUTS_COUNT]


if __name__ == "__main__":
    key = jax.random.PRNGKey(0)
    k_params, k_x = jax.random.split(key)

    batch = 8
    # Producer emits bf16 activations directly (no extra wrapper-side cast pass).
    x = jax.random.normal(k_x, (batch, INPUTS_COUNT),
                          jnp.float32).astype(jnp.bfloat16)
    params = init_params(k_params)

    out = jax.block_until_ready(mlp_forward(x, *params))
    ref = reference(x, *params)

    assert out.shape == (batch, OUTPUTS_COUNT)
    assert jnp.allclose(out, ref, atol=1e-2, rtol=1e-2), float(
        jnp.max(jnp.abs(out - ref)))

    print("KERNEL_OK")
</pallas_src>

<mosaic_0001>
module attributes {stable_mosaic.version = 11 : i64} {
  func.func @mlp_kernel(%arg0: i32, %arg1: memref<8x768xbf16, #tpu.memory_space<vmem>>, %arg2: memref<768x1024xbf16, #tpu.memory_space<vmem>>, %arg3: memref<1x1024xf32, #tpu.memory_space<vmem>>, %arg4: memref<1024x256xbf16, #tpu.memory_space<vmem>>, %arg5: memref<1x256xf32, #tpu.memory_space<vmem>>, %arg6: memref<256x128xbf16, #tpu.memory_space<vmem>>, %arg7: memref<1x128xf32, #tpu.memory_space<vmem>>, %arg8: memref<8x128xf32, #tpu.memory_space<vmem>>) attributes {dimension_semantics = [#tpu.dimension_semantics<parallel>], iteration_bounds = array<i64: 1>, scalar_prefetch = 0 : i64, scratch_operands = 0 : i64, tpu.core_type = #tpu.core_type<tc>, window_params = [{transform_indices = @transform_0, window_bounds = array<i64: 8, 768>}, {pipeline_mode = #tpu.pipeline_mode<synchronous>, transform_indices = @transform_1, window_bounds = array<i64: 768, 1024>}, {pipeline_mode = #tpu.pipeline_mode<synchronous>, transform_indices = @transform_2, window_bounds = array<i64: 1, 1024>}, {pipeline_mode = #tpu.pipeline_mode<synchronous>, transform_indices = @transform_3, window_bounds = array<i64: 1024, 256>}, {pipeline_mode = #tpu.pipeline_mode<synchronous>, transform_indices = @transform_4, window_bounds = array<i64: 1, 256>}, {pipeline_mode = #tpu.pipeline_mode<synchronous>, transform_indices = @transform_5, window_bounds = array<i64: 256, 128>}, {pipeline_mode = #tpu.pipeline_mode<synchronous>, transform_indices = @transform_6, window_bounds = array<i64: 1, 128>}, {transform_indices = @transform_7, window_bounds = array<i64: 8, 128>}]} {
    %c0 = arith.constant 0 : index
    %c0_0 = arith.constant 0 : index
    %0 = vector.load %arg1[%c0, %c0_0] : memref<8x768xbf16, #tpu.memory_space<vmem>>, vector<8x768xbf16>
    %c0_1 = arith.constant 0 : index
    %c0_2 = arith.constant 0 : index
    %1 = vector.load %arg2[%c0_1, %c0_2] : memref<768x1024xbf16, #tpu.memory_space<vmem>>, vector<768x1024xbf16>
    %cst = arith.constant dense<0.000000e+00> : vector<8x1024xf32>
    %2 = tpu.matmul %0, %1, %cst {dimension_numbers = #tpu.dot_dimension_numbers<[1], [0], [0], [1], [0, 0, 1, 1], [], []>} : vector<8x768xbf16>, vector<768x1024xbf16>, vector<8x1024xf32> -> vector<8x1024xf32>
    %c0_3 = arith.constant 0 : index
    %c0_4 = arith.constant 0 : index
    %3 = vector.load %arg3[%c0_3, %c0_4] : memref<1x1024xf32, #tpu.memory_space<vmem>>, vector<1x1024xf32>
    %4 = vector.broadcast %3 : vector<1x1024xf32> to vector<8x1024xf32>
    %5 = arith.addf %2, %4 : vector<8x1024xf32>
    %cst_5 = arith.constant 0.000000e+00 : f32
    %6 = vector.broadcast %cst_5 : f32 to vector<8x1024xf32>
    %7 = arith.maximumf %5, %6 : vector<8x1024xf32>
    %8 = arith.truncf %7 : vector<8x1024xf32> to vector<8x1024xbf16>
    %c0_6 = arith.constant 0 : index
    %c0_7 = arith.constant 0 : index
    %9 = vector.load %arg4[%c0_6, %c0_7] : memref<1024x256xbf16, #tpu.memory_space<vmem>>, vector<1024x256xbf16>
    %cst_8 = arith.constant dense<0.000000e+00> : vector<8x256xf32>
    %10 = tpu.matmul %8, %9, %cst_8 {dimension_numbers = #tpu.dot_dimension_numbers<[1], [0], [0], [1], [0, 0, 1, 1], [], []>} : vector<8x1024xbf16>, vector<1024x256xbf16>, vector<8x256xf32> -> vector<8x256xf32>
    %c0_9 = arith.constant 0 : index
    %c0_10 = arith.constant 0 : index
    %11 = vector.load %arg5[%c0_9, %c0_10] : memref<1x256xf32, #tpu.memory_space<vmem>>, vector<1x256xf32>
    %12 = vector.broadcast %11 : vector<1x256xf32> to vector<8x256xf32>
    %13 = arith.addf %10, %12 : vector<8x256xf32>
    %cst_11 = arith.constant 0.000000e+00 : f32
    %14 = vector.broadcast %cst_11 : f32 to vector<8x256xf32>
    %15 = arith.maximumf %13, %14 : vector<8x256xf32>
    %16 = arith.truncf %15 : vector<8x256xf32> to vector<8x256xbf16>
    %c0_12 = arith.constant 0 : index
    %c0_13 = arith.constant 0 : index
    %17 = vector.load %arg6[%c0_12, %c0_13] : memref<256x128xbf16, #tpu.memory_space<vmem>>, vector<256x128xbf16>
    %cst_14 = arith.constant dense<0.000000e+00> : vector<8x128xf32>
    %18 = tpu.matmul %16, %17, %cst_14 {dimension_numbers = #tpu.dot_dimension_numbers<[1], [0], [0], [1], [0, 0, 1, 1], [], []>} : vector<8x256xbf16>, vector<256x128xbf16>, vector<8x128xf32> -> vector<8x128xf32>
    %c0_15 = arith.constant 0 : index
    %c0_16 = arith.constant 0 : index
    %19 = vector.load %arg7[%c0_15, %c0_16] : memref<1x128xf32, #tpu.memory_space<vmem>>, vector<1x128xf32>
    %20 = vector.broadcast %19 : vector<1x128xf32> to vector<8x128xf32>
    %21 = arith.addf %18, %20 : vector<8x128xf32>
    %c0_17 = arith.constant 0 : index
    %c0_18 = arith.constant 0 : index
    %22 = vector.load %arg8[%c0_17, %c0_18] : memref<8x128xf32, #tpu.memory_space<vmem>>, vector<8x128xf32>
    tpu.vector_store %arg8[%c0_17, %c0_18], %21 {strides = array<i32>} : memref<8x128xf32, #tpu.memory_space<vmem>>, vector<8x128xf32>,
    return
  }
  func.func @transform_0(%arg0: i32) -> (i32, i32) {
    %c0_i32 = arith.constant 0 : i32
    %c0_i32_0 = arith.constant 0 : i32
    return %arg0, %c0_i32 : i32, i32
  }
  func.func @transform_1(%arg0: i32) -> (i32, i32) {
    %c0_i32 = arith.constant 0 : i32
    %c0_i32_0 = arith.constant 0 : i32
    %c0_i32_1 = arith.constant 0 : i32
    return %c0_i32, %c0_i32_0 : i32, i32
  }
  func.func @transform_2(%arg0: i32) -> (i32, i32) {
    %c0_i32 = arith.constant 0 : i32
    %c0_i32_0 = arith.constant 0 : i32
    %c0_i32_1 = arith.constant 0 : i32
    return %c0_i32, %c0_i32_0 : i32, i32
  }
  func.func @transform_3(%arg0: i32) -> (i32, i32) {
    %c0_i32 = arith.constant 0 : i32
    %c0_i32_0 = arith.constant 0 : i32
    %c0_i32_1 = arith.constant 0 : i32
    return %c0_i32, %c0_i32_0 : i32, i32
  }
  func.func @transform_4(%arg0: i32) -> (i32, i32) {
    %c0_i32 = arith.constant 0 : i32
    %c0_i32_0 = arith.constant 0 : i32
    %c0_i32_1 = arith.constant 0 : i32
    return %c0_i32, %c0_i32_0 : i32, i32
  }
  func.func @transform_5(%arg0: i32) -> (i32, i32) {
    %c0_i32 = arith.constant 0 : i32
    %c0_i32_0 = arith.constant 0 : i32
    %c0_i32_1 = arith.constant 0 : i32
    return %c0_i32, %c0_i32_0 : i32, i32
  }
  func.func @transform_6(%arg0: i32) -> (i32, i32) {
    %c0_i32 = arith.constant 0 : i32
    %c0_i32_0 = arith.constant 0 : i32
    %c0_i32_1 = arith.constant 0 : i32
    return %c0_i32, %c0_i32_0 : i32, i32
  }
  func.func @transform_7(%arg0: i32) -> (i32, i32) {
    %c0_i32 = arith.constant 0 : i32
    %c0_i32_0 = arith.constant 0 : i32
    return %arg0, %c0_i32 : i32, i32
  }
}

</mosaic_0001>

<bundles_post_ra>
// kernel: tpu_custom_call.1
= control target key start
LH: loop header
LB: loop body
LE: loop exit
PB: predicated region body
PF: predicated region fallthrough
CT: control target
= control target key end

     0   :  { %12 = vsyncpa [#allocation3], 0  ;;  %s5398_s0 = inlined_call_operand.hbm [shape: bf16[8,768], index: 0, kind: input, shape index: {}]   ;;  %s5399_s1 = inlined_call_operand.hbm [shape: bf16[768,1024], index: 1, kind: input, shape index: {}]   ;;  %s5400_s2 = inlined_call_operand.hbm [shape: f32[1,1024], index: 2, kind: input, shape index: {}]   ;;  %s5401_s3 = inlined_call_operand.hbm [shape: bf16[1024,256], index: 3, kind: input, shape index: {}]   ;;  %s5402_s4 = inlined_call_operand.hbm [shape: f32[1,256], index: 4, kind: input, shape index: {}]   ;;  %s5403_s5 = inlined_call_operand.hbm [shape: bf16[256,128], index: 5, kind: input, shape index: {}]   ;;  %s5404_s6 = inlined_call_operand.hbm [shape: f32[1,128], index: 6, kind: input, shape index: {}]   ;;  %s5405_s7 = inlined_call_operand.hbm [shape: f32[8,128], index: 7, kind: output, shape index: {}]  }
   0x1   :  { %13 = vsyncpa [#allocation6], 0 }
   0x2   :  { %14 = vsyncpa [#allocation9], 0 }
   0x3   :  { %15 = vsyncpa [#allocation12], 0 }
   0x4   :  { %16 = vsyncpa [#allocation4], 0  ;;  %s5159_s24 = smov [#allocation5]   ;;  %s4973_s28 = scalar_lea.hbm %s5399_s1, 49152 }
   0x5   :  { %s32_s25 = sshll.u32 %s5159_s24, 4  ;;  %p4974_p0 = scmp.ne.s32.totalorder %s5399_s1, %s4973_s28  ;;  %s33_s25 = int_to_ptr.vmem [resolvable:$true] %s32_s25 }
   0x6   :  { %p4977_p1 = scmp.lt.u32.totalorder %s4973_s28, %s5399_s1 }
   0x8   :  { %p4979_p2 = pnand %p4977_p1, %p4974_p0 }
   0xa   :  { %4982 = shalt.err (!%p4979_p2)
}
   0xb   :  { %s4983_s10 = scalar_lea.vmem %s33_s25, 49152  ;;  %p4988_p4 = scmp.lt.s32.totalorder %s33_s25, %s33_s25 }
   0xc   :  { %p4984_p3 = scmp.ne.s32.totalorder %s33_s25, %s4983_s10  ;;  %p4989_p5 = scmp.lt.s32.totalorder %s4983_s10, %s4983_s10 }
   0xe   :  { %p4990_p6 = por %p4989_p5, %p4988_p4 }
  0x10   :  { %p4991_p7 = pnand %p4990_p6, %p4984_p3 }
  0x12   :  { %4994 = shalt.err (!%p4991_p7)
}
  0x13   :  { %s5160_s11 = smov 512   ;;  %s5161_s12 = smov 32  }
  0x14   :  { %38 = dma.hbm_to_vmem [thread:$0]  %s5399_s1, 49152, %s33_s25, [#allocation6], %s5160_s11, %s5160_s11, %s5161_s12  }
  0x15   :  { %s5162_s15 = smov [#allocation8]   ;;  %s4995_s19 = scalar_lea.hbm %s5401_s3, 16384 }
  0x16   :  { %s54_s16 = sshll.u32 %s5162_s15, 4  ;;  %p4996_p8 = scmp.ne.s32.totalorder %s5401_s3, %s4995_s19  ;;  %s55_s16 = int_to_ptr.vmem [resolvable:$true] %s54_s16 }
  0x17   :  { %p4999_p9 = scmp.lt.u32.totalorder %s4995_s19, %s5401_s3 }
  0x19   :  { %p5001_p10 = pnand %p4999_p9, %p4996_p8 }
  0x1b   :  { %5004 = shalt.err (!%p5001_p10)
}
  0x1c   :  { %s5005_s24 = scalar_lea.vmem %s55_s16, 16384  ;;  %p5010_p12 = scmp.lt.s32.totalorder %s55_s16, %s55_s16 }
  0x1d   :  { %p5006_p11 = scmp.ne.s32.totalorder %s55_s16, %s5005_s24  ;;  %p5011_p13 = scmp.lt.s32.totalorder %s5005_s24, %s5005_s24 }
  0x1f   :  { %p5012_p0 = por %p5011_p13, %p5010_p12 }
  0x21   :  { %p5013_p1 = pnand %p5012_p0, %p5006_p11 }
  0x23   :  { %5016 = shalt.err (!%p5013_p1)
}
  0x24   :  { %s5163_s1 = smov 128   ;;  %s5164_s25 = smov 8  }
  0x25   :  { %60 = dma.hbm_to_vmem [thread:$0]  %s5401_s3, 16384, %s55_s16, [#allocation9], %s5163_s1, %s5163_s1, %s5164_s25  }
  0x26   :  { %s5165_s28 = smov [#allocation11]   ;;  %s5017_s9 = scalar_lea.hbm %s5403_s5, 2048 }
  0x27   :  { %s76_s29 = sshll.u32 %s5165_s28, 4  ;;  %p5018_p2 = scmp.ne.s32.totalorder %s5403_s5, %s5017_s9  ;;  %s77_s29 = int_to_ptr.vmem [resolvable:$true] %s76_s29 }
  0x28   :  { %p5021_p3 = scmp.lt.u32.totalorder %s5017_s9, %s5403_s5 }
  0x2a   :  { %p5023_p4 = pnand %p5021_p3, %p5018_p2 }
  0x2c   :  { %5026 = shalt.err (!%p5023_p4)
}
  0x2d   :  { %s5027_s14 = scalar_lea.vmem %s77_s29, 2048  ;;  %p5032_p6 = scmp.lt.s32.totalorder %s77_s29, %s77_s29 }
  0x2e   :  { %p5028_p5 = scmp.ne.s32.totalorder %s77_s29, %s5027_s14  ;;  %p5033_p7 = scmp.lt.s32.totalorder %s5027_s14, %s5027_s14 }
  0x30   :  { %p5034_p8 = por %p5033_p7, %p5032_p6 }
  0x32   :  { %p5035_p9 = pnand %p5034_p8, %p5028_p5 }
  0x34   :  { %5038 = shalt.err (!%p5035_p9)
}
  0x35   :  { %s5166_s3 = smov 64   ;;  %s5167_s15 = smov 4  }
  0x36   :  { %82 = dma.hbm_to_vmem [thread:$0]  %s5403_s5, 2048, %s77_s29, [#allocation12], %s5166_s3, %s5166_s3, %s5167_s15  }
  0x37   :  { %s5168_s18 = smov [#allocation2]   ;;  %s5169_s20 = smov [#allocation7]  }
  0x38   :  { %s23_s19 = sshll.u32 %s5168_s18, 4  ;;  %s45_s21 = sshll.u32 %s5169_s20, 4  ;;  %s24_s19 = int_to_ptr.vmem [resolvable:$true] %s23_s19  ;;  %s46_s21 = int_to_ptr.vmem [resolvable:$true] %s45_s21 }
  0x39   :  { %s5039_s24 = scalar_lea.hbm %s5398_s0, 384 }
  0x3a   :  { %p5040_p10 = scmp.ne.s32.totalorder %s5398_s0, %s5039_s24  ;;  %p5043_p11 = scmp.lt.u32.totalorder %s5039_s24, %s5398_s0 }
  0x3c   :  { %p5045_p12 = pnand %p5043_p11, %p5040_p10 }
  0x3e   :  { %5048 = shalt.err (!%p5045_p12)
}
  0x3f   :  { %s5049_s5 = scalar_lea.vmem %s24_s19, 384  ;;  %p5054_p0 = scmp.lt.s32.totalorder %s24_s19, %s24_s19 }
  0x40   :  { %p5050_p13 = scmp.ne.s32.totalorder %s24_s19, %s5049_s5  ;;  %p5055_p1 = scmp.lt.s32.totalorder %s5049_s5, %s5049_s5 }
  0x42   :  { %p5056_p2 = por %p5055_p1, %p5054_p0 }
  0x44   :  { %p5057_p3 = pnand %p5056_p2, %p5050_p13 }
  0x46   :  { %5060 = shalt.err (!%p5057_p3)
}
  0x47   :  { %26 = dma.hbm_to_vmem [thread:$0]  %s5398_s0, 384, %s24_s19, [#allocation3]  }
  0x48   :  { %s5061_s9 = scalar_lea.hbm %s5400_s2, 128 }
  0x49   :  { %p5062_p4 = scmp.ne.s32.totalorder %s5400_s2, %s5061_s9  ;;  %p5065_p5 = scmp.lt.u32.totalorder %s5061_s9, %s5400_s2 }
  0x4b   :  { %p5067_p6 = pnand %p5065_p5, %p5062_p4 }
  0x4d   :  { %5070 = shalt.err (!%p5067_p6)
}
  0x4e   :  { %s5071_s14 = scalar_lea.vmem %s46_s21, 128  ;;  %p5076_p8 = scmp.lt.s32.totalorder %s46_s21, %s46_s21 }
  0x4f   :  { %p5072_p7 = scmp.ne.s32.totalorder %s46_s21, %s5071_s14  ;;  %p5077_p9 = scmp.lt.s32.totalorder %s5071_s14, %s5071_s14 }
  0x51   :  { %p5078_p10 = por %p5077_p9, %p5076_p8 }
  0x53   :  { %p5079_p11 = pnand %p5078_p10, %p5072_p7 }
  0x55   :  { %5082 = shalt.err (!%p5079_p11)
}
  0x56   :  { %48 = dma.hbm_to_vmem [thread:$0]  %s5400_s2, 128, %s46_s21, [#allocation6]  }
  0x57   :  { %s5170_s15 = smov [#allocation10]   ;;  %s5171_s17 = smov [#allocation13]  }
  0x58   :  { %s67_s16 = sshll.u32 %s5170_s15, 4  ;;  %s89_s18 = sshll.u32 %s5171_s17, 4  ;;  %s68_s16 = int_to_ptr.vmem [resolvable:$true] %s67_s16  ;;  %s90_s18 = int_to_ptr.vmem [resolvable:$true] %s89_s18 }
  0x59   :  { %s5083_s22 = scalar_lea.hbm %s5402_s4, 32 }
  0x5a   :  { %p5084_p12 = scmp.ne.s32.totalorder %s5402_s4, %s5083_s22  ;;  %p5087_p13 = scmp.lt.u32.totalorder %s5083_s22, %s5402_s4 }
  0x5c   :  { %p5089_p0 = pnand %p5087_p13, %p5084_p12 }
  0x5e   :  { %5092 = shalt.err (!%p5089_p0)
}
  0x5f   :  { %s5093_s2 = scalar_lea.vmem %s68_s16, 32  ;;  %p5098_p2 = scmp.lt.s32.totalorder %s68_s16, %s68_s16 }
  0x60   :  { %p5094_p1 = scmp.ne.s32.totalorder %s68_s16, %s5093_s2  ;;  %p5099_p3 = scmp.lt.s32.totalorder %s5093_s2, %s5093_s2 }
  0x62   :  { %p5100_p4 = por %p5099_p3, %p5098_p2 }
  0x64   :  { %p5101_p5 = pnand %p5100_p4, %p5094_p1 }
  0x66   :  { %5104 = shalt.err (!%p5101_p5)
}
  0x67   :  { %70 = dma.hbm_to_vmem [thread:$0]  %s5402_s4, 32, %s68_s16, [#allocation9]  }
  0x68   :  { %s5105_s28 = scalar_lea.hbm %s5404_s6, 16 }
  0x69   :  { %p5106_p6 = scmp.ne.s32.totalorder %s5404_s6, %s5105_s28  ;;  %p5109_p7 = scmp.lt.u32.totalorder %s5105_s28, %s5404_s6 }
  0x6b   :  { %p5111_p8 = pnand %p5109_p7, %p5106_p6 }
  0x6d   :  { %5114 = shalt.err (!%p5111_p8)
}
  0x6e   :  { %s5115_s10 = scalar_lea.vmem %s90_s18, 16  ;;  %s5119_s11 = scalar_lea.vmem %s90_s18, 32 }
  0x6f   :  { %p5116_p9 = scmp.ne.s32.totalorder %s90_s18, %s5115_s10  ;;  %p5120_p10 = scmp.lt.s32.totalorder %s90_s18, %s90_s18 }
  0x70   :  { %p5121_p11 = scmp.lt.s32.totalorder %s5119_s11, %s5115_s10 }
  0x72   :  { %p5122_p12 = por %p5121_p11, %p5120_p10 }
  0x74   :  { %p5123_p13 = pnand %p5122_p12, %p5116_p9 }
  0x76   :  { %5126 = shalt.err (!%p5123_p13)
}
  0x77   :  { %92 = dma.hbm_to_vmem [thread:$0]  %s5404_s6, 16, %s90_s18, [#allocation12]  }
  0x78   :  { %5149 = dma.done.wait [#allocation3], 384  }
  0x79   :  { %5150 = vsyncadd [#allocation3], 4294966912 }
  0x7a   :  { %5151 = dma.done.wait [#allocation6], 49280  }
  0x7b   :  { %5152 = vsyncadd [#allocation6], 4294918016 }
  0x7c   :  { %5153 = dma.done.wait [#allocation9], 16416  }
  0x7d   :  { %5154 = vsyncadd [#allocation9], 4294950880 }
  0x7e   :  { %5155 = dma.done.wait [#allocation12], 2064  }
  0x7f   :  { %5156 = vsyncadd [#allocation12], 4294965232  ;;  %v118_v0 = vld [vmem:[#allocation5] sm:$0xff]  ;;  %v5297_v39 = vld [vmem:[#allocation2] sm:$0xff]  ;;  %s5172_s6 = smov [#allocation14]  }
  0x80   :  { %v122_v1 = vld [vmem:[#allocation5 + $0x20] sm:$0xff]  ;;  %v5301_v42 = vcombine.high %v5297_v39, %v5297_v39  ;;  %s4123_s13 = sshll.u32 %s5172_s6, 4  ;;  %s4124_s13 = int_to_ptr.vmem [resolvable:$true] %s4123_s13 }
  0x81   :  { %v126_v2 = vld [vmem:[#allocation5 + $0x40] sm:$0xff]  ;;  %v4142_v3 = vcombine.high %v118_v0, %v122_v1  ;;  %v4141_v4 = vcombine.low %v118_v0, %v122_v1  ;;  %v5304_v0 = vld [vmem:[#allocation2 + $0x10] sm:$0xff]  ;;  %s5127_s14 = scalar_lea.vmem %s4124_s13, 128  ;;  %p5132_p1 = scmp.lt.s32.totalorder %s4124_s13, %s4124_s13 }
  0x82   :  { %v130_v5 = vld [vmem:[#allocation5 + $0x60] sm:$0xff]  ;;  %2517 = vmatprep.mubr.bf16.mxu1 %v5301_v42  ;;  %p5128_p0 = scmp.ne.s32.totalorder %s4124_s13, %s5127_s14  ;;  %p5133_p2 = scmp.lt.s32.totalorder %s5127_s14, %s5127_s14 }
  0x83   :  { %v4150_v6 = vcombine.high %v126_v2, %v130_v5  ;;  %v134_v7 = vld [vmem:[#allocation5 + $0x80] sm:$0xff]  ;;  %2485 = vmatprep.subr.bf16.mxu1 %v4142_v3  ;;  %v4149_v9 = vcombine.low %v126_v2, %v130_v5  ;;  %v5308_v2 = vcombine.high %v5304_v0, %v5304_v0 }
  0x84   :  { %v138_v8 = vld [vmem:[#allocation5 + $0xa0] sm:$0xff]  ;;  %2486 = vmatpush1.bf16.msra.mxu1 %v4141_v4  ;;  %p5134_p3 = por %p5133_p2, %p5132_p1 }
  0x85   :  { %2487 = vmatprep.subr.bf16.mxu1 %v4150_v6  ;;  %v4158_v10 = vcombine.high %v134_v7, %v138_v8  ;;  %v374_v11 = vld [vmem:[#allocation5 + $0x800] sm:$0xff]  ;;  %v4157_v19 = vcombine.low %v134_v7, %v138_v8  ;;  %2599 = vmatprep.mubr.bf16.mxu0 %v5308_v2 }
  0x86   :  { %v378_v12 = vld [vmem:[#allocation5 + $0x820] sm:$0xff]  ;;  %p5135_p4 = pnand %p5134_p3, %p5128_p0 }
  0x87   :  { %v142_v13 = vld [vmem:[#allocation5 + $0xc0] sm:$0xff]  ;;  %v4398_v15 = vcombine.high %v374_v11, %v378_v12  ;;  %v4397_v16 = vcombine.low %v374_v11, %v378_v12 }
  0x88   :  { %v146_v14 = vld [vmem:[#allocation5 + $0xe0] sm:$0xff]  ;;  %2488 = vmatpush1.bf16.msra.mxu1 %v4149_v9 }
  0x89   :  { %v382_v17 = vld [vmem:[#allocation5 + $0x840] sm:$0xff]  ;;  %2567 = vmatprep.subr.bf16.mxu0 %v4398_v15  ;;  %2489 = vmatprep.subr.bf16.mxu1 %v4158_v10  ;;  %v4166_v23 = vcombine.high %v142_v13, %v146_v14  ;;  %v4165_v30 = vcombine.low %v142_v13, %v146_v14 }
  0x8a   :  { %v386_v18 = vld [vmem:[#allocation5 + $0x860] sm:$0xff]  ;;  %2568 = vmatpush1.bf16.msra.mxu0 %v4397_v16 }
  0x8b   :  { %v4406_v20 = vcombine.high %v382_v17, %v386_v18  ;;  %v390_v21 = vld [vmem:[#allocation5 + $0x880] sm:$0xff]  ;;  %v4405_v24 = vcombine.low %v382_v17, %v386_v18 }
  0x8c   :  { %v394_v22 = vld [vmem:[#allocation5 + $0x8a0] sm:$0xff]  ;;  %2490 = vmatpush1.bf16.msra.mxu1 %v4157_v19 }
  0x8d   :  { %v150_v25 = vld [vmem:[#allocation5 + $0x100] sm:$0xff]  ;;  %2569 = vmatprep.subr.bf16.mxu0 %v4406_v20  ;;  %v4414_v27 = vcombine.high %v390_v21, %v394_v22  ;;  %2491 = vmatprep.subr.bf16.mxu1 %v4166_v23  ;;  %v4413_v32 = vcombine.low %v390_v21, %v394_v22 }
  0x8e   :  { %v154_v26 = vld [vmem:[#allocation5 + $0x120] sm:$0xff]  ;;  %2570 = vmatpush1.bf16.msra.mxu0 %v4405_v24 }
  0x8f   :  { %v398_v28 = vld [vmem:[#allocation5 + $0x8c0] sm:$0xff]  ;;  %v4174_v31 = vcombine.high %v150_v25, %v154_v26  ;;  %2571 = vmatprep.subr.bf16.mxu0 %v4414_v27  ;;  %v4173_v38 = vcombine.low %v150_v25, %v154_v26 }
  0x90   :  { %v402_v29 = vld [vmem:[#allocation5 + $0x8e0] sm:$0xff]  ;;  %2492 = vmatpush1.bf16.msra.mxu1 %v4165_v30 }
  0x91   :  { %v158_v33 = vld [vmem:[#allocation5 + $0x140] sm:$0xff]  ;;  %v4422_v35 = vcombine.high %v398_v28, %v402_v29  ;;  %2493 = vmatprep.subr.bf16.mxu1 %v4174_v31  ;;  %v4421_v41 = vcombine.low %v398_v28, %v402_v29 }
  0x92   :  { %v162_v34 = vld [vmem:[#allocation5 + $0x160] sm:$0xff]  ;;  %2572 = vmatpush1.bf16.msra.mxu0 %v4413_v32 }
  0x93   :  { %v406_v36 = vld [vmem:[#allocation5 + $0x900] sm:$0xff]  ;;  %v4182_v40 = vcombine.high %v158_v33, %v162_v34  ;;  %2573 = vmatprep.subr.bf16.mxu0 %v4422_v35  ;;  %v4181_v48 = vcombine.low %v158_v33, %v162_v34 }
  0x94   :  { %v410_v37 = vld [vmem:[#allocation5 + $0x920] sm:$0xff]  ;;  %2494 = vmatpush1.bf16.msra.mxu1 %v4173_v38 }
  0x95   :  { %v166_v43 = vld [vmem:[#allocation5 + $0x180] sm:$0xff]  ;;  %v4430_v45 = vcombine.high %v406_v36, %v410_v37  ;;  %2495 = vmatprep.subr.bf16.mxu1 %v4182_v40  ;;  %v4429_v50 = vcombine.low %v406_v36, %v410_v37 }
  0x96   :  { %v170_v44 = vld [vmem:[#allocation5 + $0x1a0] sm:$0xff]  ;;  %2574 = vmatpush1.bf16.msra.mxu0 %v4421_v41 }
  0x97   :  { %v414_v46 = vld [vmem:[#allocation5 + $0x940] sm:$0xff]  ;;  %v4190_v49 = vcombine.high %v166_v43, %v170_v44  ;;  %2575 = vmatprep.subr.bf16.mxu0 %v4430_v45  ;;  %v4189_v56 = vcombine.low %v166_v43, %v170_v44 }
  0x98   :  { %v418_v47 = vld [vmem:[#allocation5 + $0x960] sm:$0xff]  ;;  %2496 = vmatpush1.bf16.msra.mxu1 %v4181_v48 }
  0x99   :  { %v174_v51 = vld [vmem:[#allocation5 + $0x1c0] sm:$0xff]  ;;  %v4438_v53 = vcombine.high %v414_v46, %v418_v47  ;;  %2497 = vmatprep.subr.bf16.mxu1 %v4190_v49  ;;  %v4437_v58 = vcombine.low %v414_v46, %v418_v47 }
  0x9a   :  { %v178_v52 = vld [vmem:[#allocation5 + $0x1e0] sm:$0xff]  ;;  %2576 = vmatpush1.bf16.msra.mxu0 %v4429_v50 }
  0x9b   :  { %v422_v54 = vld [vmem:[#allocation5 + $0x980] sm:$0xff]  ;;  %v4198_v57 = vcombine.high %v174_v51, %v178_v52  ;;  %2577 = vmatprep.subr.bf16.mxu0 %v4438_v53  ;;  %v4197_v1 = vcombine.low %v174_v51, %v178_v52 }
  0x9c   :  { %v426_v55 = vld [vmem:[#allocation5 + $0x9a0] sm:$0xff]  ;;  %2498 = vmatpush1.bf16.msra.mxu1 %v4189_v56 }
  0x9d   :  { %v182_v59 = vld [vmem:[#allocation5 + $0x200] sm:$0xff]  ;;  %v4446_v61 = vcombine.high %v422_v54, %v426_v55  ;;  %2499 = vmatprep.subr.bf16.mxu1 %v4198_v57  ;;  %v4445_v4 = vcombine.low %v422_v54, %v426_v55 }
  0x9e   :  { %v186_v60 = vld [vmem:[#allocation5 + $0x220] sm:$0xff]  ;;  %2578 = vmatpush1.bf16.msra.mxu0 %v4437_v58 }
  0x9f   :  { %v430_v62 = vld [vmem:[#allocation5 + $0x9c0] sm:$0xff]  ;;  %v4206_v3 = vcombine.high %v182_v59, %v186_v60  ;;  %2579 = vmatprep.subr.bf16.mxu0 %v4446_v61  ;;  %v4205_v10 = vcombine.low %v182_v59, %v186_v60 }
  0xa0   :  { %v434_v63 = vld [vmem:[#allocation5 + $0x9e0] sm:$0xff]  ;;  %2500 = vmatpush1.bf16.msra.mxu1 %v4197_v1 }
  0xa1   :  { %v190_v5 = vld [vmem:[#allocation5 + $0x240] sm:$0xff]  ;;  %v4454_v7 = vcombine.high %v430_v62, %v434_v63  ;;  %2501 = vmatprep.subr.bf16.mxu1 %v4206_v3  ;;  %v4453_v12 = vcombine.low %v430_v62, %v434_v63 }
  0xa2   :  { %v194_v6 = vld [vmem:[#allocation5 + $0x260] sm:$0xff]  ;;  %2580 = vmatpush1.bf16.msra.mxu0 %v4445_v4 }
  0xa3   :  { %v438_v8 = vld [vmem:[#allocation5 + $0xa00] sm:$0xff]  ;;  %v4214_v11 = vcombine.high %v190_v5, %v194_v6  ;;  %2581 = vmatprep.subr.bf16.mxu0 %v4454_v7  ;;  %v4213_v18 = vcombine.low %v190_v5, %v194_v6 }
  0xa4   :  { %v442_v9 = vld [vmem:[#allocation5 + $0xa20] sm:$0xff]  ;;  %2502 = vmatpush1.bf16.msra.mxu1 %v4205_v10 }
  0xa5   :  { %v198_v13 = vld [vmem:[#allocation5 + $0x280] sm:$0xff]  ;;  %v4462_v15 = vcombine.high %v438_v8, %v442_v9  ;;  %2503 = vmatprep.subr.bf16.mxu1 %v4214_v11  ;;  %v4461_v20 = vcombine.low %v438_v8, %v442_v9  ;;  %v5311_v9 = vld [vmem:[#allocation2 + $0x8] sm:$0xff] }
  0xa6   :  { %v202_v14 = vld [vmem:[#allocation5 + $0x2a0] sm:$0xff]  ;;  %2582 = vmatpush1.bf16.msra.mxu0 %v4453_v12 }
  0xa7   :  { %v446_v16 = vld [vmem:[#allocation5 + $0xa40] sm:$0xff]  ;;  %v4222_v19 = vcombine.high %v198_v13, %v202_v14  ;;  %2583 = vmatprep.subr.bf16.mxu0 %v4462_v15  ;;  %v4221_v26 = vcombine.low %v198_v13, %v202_v14  ;;  %v120_v13 = vld [vmem:[#allocation5 + $0x10] sm:$0xff]  ;;  %v5315_v15 = vcombine.low %v5297_v39, %v5297_v39 }
  0xa8   :  { %v450_v17 = vld [vmem:[#allocation5 + $0xa60] sm:$0xff]  ;;  %2504 = vmatpush1.bf16.msra.mxu1 %v4213_v18  ;;  %v124_v14 = vld [vmem:[#allocation5 + $0x30] sm:$0xff] }
  0xa9   :  { %v206_v21 = vld [vmem:[#allocation5 + $0x2c0] sm:$0xff]  ;;  %v4470_v23 = vcombine.high %v446_v16, %v450_v17  ;;  %2505 = vmatprep.subr.bf16.mxu1 %v4222_v19  ;;  %v4469_v28 = vcombine.low %v446_v16, %v450_v17  ;;  %v5319_v19 = vcombine.high %v5311_v9, %v5311_v9 }
  0xaa   :  { %v210_v22 = vld [vmem:[#allocation5 + $0x2e0] sm:$0xff]  ;;  %2584 = vmatpush1.bf16.msra.mxu0 %v4461_v20 }
  0xab   :  { %v454_v24 = vld [vmem:[#allocation5 + $0xa80] sm:$0xff]  ;;  %v4230_v27 = vcombine.high %v206_v21, %v210_v22  ;;  %2585 = vmatprep.subr.bf16.mxu0 %v4470_v23  ;;  %v4229_v34 = vcombine.low %v206_v21, %v210_v22  ;;  %v4146_v22 = vcombine.high %v120_v13, %v124_v14  ;;  %v128_v23 = vld [vmem:[#allocation5 + $0x50] sm:$0xff] }
  0xac   :  { %v458_v25 = vld [vmem:[#allocation5 + $0xaa0] sm:$0xff]  ;;  %2506 = vmatpush1.bf16.msra.mxu1 %v4221_v26 }
  0xad   :  { %v214_v29 = vld [vmem:[#allocation5 + $0x300] sm:$0xff]  ;;  %v4478_v31 = vcombine.high %v454_v24, %v458_v25  ;;  %2507 = vmatprep.subr.bf16.mxu1 %v4230_v27  ;;  %v4477_v36 = vcombine.low %v454_v24, %v458_v25  ;;  %v132_v24 = vld [vmem:[#allocation5 + $0x70] sm:$0xff]  ;;  %v5324_v27 = vcombine.low %v5304_v0, %v5304_v0 }
  0xae   :  { %v218_v30 = vld [vmem:[#allocation5 + $0x320] sm:$0xff]  ;;  %2586 = vmatpush1.bf16.msra.mxu0 %v4469_v28  ;;  %v4153_v0 = vcombine.low %v128_v23, %v132_v24 }
  0xaf   :  { %v462_v32 = vld [vmem:[#allocation5 + $0xac0] sm:$0xff]  ;;  %v4238_v35 = vcombine.high %v214_v29, %v218_v30  ;;  %2587 = vmatprep.subr.bf16.mxu0 %v4478_v31  ;;  %v4237_v44 = vcombine.low %v214_v29, %v218_v30  ;;  %v4145_v29 = vcombine.low %v120_v13, %v124_v14  ;;  %v4154_v30 = vcombine.high %v128_v23, %v132_v24  ;;  %v136_v31 = vld [vmem:[#allocation5 + $0x90] sm:$0xff] }
  0xb0   :  { %v466_v33 = vld [vmem:[#allocation5 + $0xae0] sm:$0xff]  ;;  %2508 = vmatpush1.bf16.msra.mxu1 %v4229_v34 }
  0xb1   :  { %v222_v37 = vld [vmem:[#allocation5 + $0x340] sm:$0xff]  ;;  %v4486_v40 = vcombine.high %v462_v32, %v466_v33  ;;  %2509 = vmatprep.subr.bf16.mxu1 %v4238_v35  ;;  %v4485_v46 = vcombine.low %v462_v32, %v466_v33  ;;  %v140_v32 = vld [vmem:[#allocation5 + $0xb0] sm:$0xff] }
  0xb2   :  { %v226_v38 = vld [vmem:[#allocation5 + $0x360] sm:$0xff]  ;;  %2588 = vmatpush1.bf16.msra.mxu0 %v4477_v36 }
  0xb3   :  { %v470_v41 = vld [vmem:[#allocation5 + $0xb00] sm:$0xff]  ;;  %v4246_v45 = vcombine.high %v222_v37, %v226_v38  ;;  %2589 = vmatprep.subr.bf16.mxu0 %v4486_v40  ;;  %v4245_v52 = vcombine.low %v222_v37, %v226_v38  ;;  %v4162_v37 = vcombine.high %v136_v31, %v140_v32  ;;  %v144_v38 = vld [vmem:[#allocation5 + $0xd0] sm:$0xff] }
  0xb4   :  { %v474_v43 = vld [vmem:[#allocation5 + $0xb20] sm:$0xff]  ;;  %2510 = vmatpush1.bf16.msra.mxu1 %v4237_v44  ;;  %v148_v40 = vld [vmem:[#allocation5 + $0xf0] sm:$0xff] }
  0xb5   :  { %v230_v47 = vld [vmem:[#allocation5 + $0x380] sm:$0xff]  ;;  %v4494_v49 = vcombine.high %v470_v41, %v474_v43  ;;  %2511 = vmatprep.subr.bf16.mxu1 %v4246_v45  ;;  %v4493_v54 = vcombine.low %v470_v41, %v474_v43 }
  0xb6   :  { %v234_v48 = vld [vmem:[#allocation5 + $0x3a0] sm:$0xff]  ;;  %2590 = vmatpush1.bf16.msra.mxu0 %v4485_v46  ;;  %v4161_v46 = vcombine.low %v136_v31, %v140_v32 }
  0xb7   :  { %v478_v50 = vld [vmem:[#allocation5 + $0xb40] sm:$0xff]  ;;  %v4254_v53 = vcombine.high %v230_v47, %v234_v48  ;;  %2591 = vmatprep.subr.bf16.mxu0 %v4494_v49  ;;  %v4253_v60 = vcombine.low %v230_v47, %v234_v48  ;;  %v4170_v47 = vcombine.high %v144_v38, %v148_v40  ;;  %v152_v48 = vld [vmem:[#allocation5 + $0x110] sm:$0xff] }
  0xb8   :  { %v482_v51 = vld [vmem:[#allocation5 + $0xb60] sm:$0xff]  ;;  %2512 = vmatpush1.bf16.msra.mxu1 %v4245_v52  ;;  %v156_v49 = vld [vmem:[#allocation5 + $0x130] sm:$0xff] }
  0xb9   :  { %v238_v55 = vld [vmem:[#allocation5 + $0x3c0] sm:$0xff]  ;;  %v4502_v57 = vcombine.high %v478_v50, %v482_v51  ;;  %2513 = vmatprep.subr.bf16.mxu1 %v4254_v53  ;;  %v4501_v63 = vcombine.low %v478_v50, %v482_v51 }
  0xba   :  { %v242_v56 = vld [vmem:[#allocation5 + $0x3e0] sm:$0xff]  ;;  %2592 = vmatpush1.bf16.msra.mxu0 %v4493_v54  ;;  %v4169_v54 = vcombine.low %v144_v38, %v148_v40 }
  0xbb   :  { %v486_v58 = vld [vmem:[#allocation5 + $0xb80] sm:$0xff]  ;;  %v4262_v61 = vcombine.high %v238_v55, %v242_v56  ;;  %2593 = vmatprep.subr.bf16.mxu0 %v4502_v57  ;;  %v4261_v6 = vcombine.low %v238_v55, %v242_v56  ;;  %v4178_v55 = vcombine.high %v152_v48, %v156_v49  ;;  %v160_v56 = vld [vmem:[#allocation5 + $0x150] sm:$0xff] }
  0xbc   :  { %v490_v59 = vld [vmem:[#allocation5 + $0xba0] sm:$0xff]  ;;  %2514 = vmatpush1.bf16.msra.mxu1 %v4253_v60  ;;  %v164_v57 = vld [vmem:[#allocation5 + $0x170] sm:$0xff] }
  0xbd   :  { %v246_v62 = vld [vmem:[#allocation5 + $0x400] sm:$0xff]  ;;  %v4510_v3 = vcombine.high %v486_v58, %v490_v59  ;;  %2515 = vmatprep.subr.bf16.mxu1 %v4262_v61  ;;  %v4509_v11 = vcombine.low %v486_v58, %v490_v59 }
  0xbe   :  { %v250_v1 = vld [vmem:[#allocation5 + $0x420] sm:$0xff]  ;;  %2594 = vmatpush1.bf16.msra.mxu0 %v4501_v63  ;;  %v4186_v63 = vcombine.high %v160_v56, %v164_v57 }
  0xbf   :  { %v494_v4 = vld [vmem:[#allocation5 + $0xbc0] sm:$0xff]  ;;  %v4270_v10 = vcombine.high %v246_v62, %v250_v1  ;;  %2595 = vmatprep.subr.bf16.mxu0 %v4510_v3  ;;  %v4269_v16 = vcombine.low %v246_v62, %v250_v1  ;;  %v4177_v62 = vcombine.low %v152_v48, %v156_v49  ;;  %v168_v1 = vld [vmem:[#allocation5 + $0x190] sm:$0xff] }
  0xc0   :  { %v498_v5 = vld [vmem:[#allocation5 + $0xbe0] sm:$0xff]  ;;  %2516 = vmatpush1.bf16.msra.mxu1 %v4261_v6  ;;  %v172_v3 = vld [vmem:[#allocation5 + $0x1b0] sm:$0xff] }
  0xc1   :  { %v254_v7 = vld [vmem:[#allocation5 + $0x440] sm:$0xff]  ;;  %v4518_v12 = vcombine.high %v494_v4, %v498_v5  ;;  %2526 = vmatprep.subr.bf16.mxu1 %v4270_v10  ;;  %v4517_v21 = vcombine.low %v494_v4, %v498_v5  ;;  %v4194_v10 = vcombine.high %v168_v1, %v172_v3 }
  0xc2   :  { %v258_v8 = vld [vmem:[#allocation5 + $0x460] sm:$0xff]  ;;  %2596 = vmatpush1.bf16.msra.mxu0 %v4509_v11  ;;  %v176_v11 = vld [vmem:[#allocation5 + $0x1d0] sm:$0xff] }
  0xc3   :  { %v262_v17 = vld [vmem:[#allocation5 + $0x480] sm:$0xff]  ;;  %v4278_v20 = vcombine.high %v254_v7, %v258_v8  ;;  %2597 = vmatprep.subr.bf16.mxu0 %v4518_v12  ;;  %2518 = vmatmul.mubr.bf16.vlgmr.msra.gmra.mrb[0].mxu1 %v5315_v15  ;;  %v4277_v39 = vcombine.low %v254_v7, %v258_v8  ;;  %v4185_v8 = vcombine.low %v160_v56, %v164_v57  ;;  %v180_v12 = vld [vmem:[#allocation5 + $0x1f0] sm:$0xff] }
  0xc4   :  { %v266_v18 = vld [vmem:[#allocation5 + $0x4a0] sm:$0xff]  ;;  %2527 = vmatpush1.bf16.msra.mxu1 %v4269_v16  ;;  %2558 = vmatprep.mubr.bf16.mxu1 %v5319_v19 }
  0xc5   :  { %v270_v25 = vld [vmem:[#allocation5 + $0x4c0] sm:$0xff]  ;;  %2528 = vmatprep.subr.bf16.mxu1 %v4278_v20  ;;  %v4286_v28 = vcombine.high %v262_v17, %v266_v18  ;;  %v4285_v33 = vcombine.low %v262_v17, %v266_v18  ;;  %v4193_v18 = vcombine.low %v168_v1, %v172_v3  ;;  %v4202_v20 = vcombine.high %v176_v11, %v180_v12 }
  0xc6   :  { %v274_v26 = vld [vmem:[#allocation5 + $0x4e0] sm:$0xff]  ;;  %2598 = vmatpush1.bf16.msra.mxu0 %v4517_v21  ;;  %v184_v21 = vld [vmem:[#allocation5 + $0x210] sm:$0xff] }
  0xc7   :  { %2731 = vmatprep.subr.bf16.mxu0 %v4146_v22  ;;  %v278_v34 = vld [vmem:[#allocation5 + $0x500] sm:$0xff]  ;;  %v4294_v36 = vcombine.high %v270_v25, %v274_v26  ;;  %v4293_v41 = vcombine.low %v270_v25, %v274_v26  ;;  %v188_v22 = vld [vmem:[#allocation5 + $0x230] sm:$0xff]  ;;  %v4201_v26 = vcombine.low %v176_v11, %v180_v12  ;;  %v119_v12 = vld [vmem:[#allocation5 + $0x8] sm:$0xff] }
  0xc8   :  { %2529 = vmatpush1.bf16.msra.mxu1 %v4277_v39  ;;  %v282_v35 = vld [vmem:[#allocation5 + $0x520] sm:$0xff] }
  0xc9   :  { %2600 = vmatmul.mubr.bf16.vlgmr.msra.gmra.mrb[0].mxu0 %v5324_v27  ;;  %2530 = vmatprep.subr.bf16.mxu1 %v4286_v28  ;;  %v286_v43 = vld [vmem:[#allocation5 + $0x540] sm:$0xff]  ;;  %v4302_v45 = vcombine.high %v278_v34, %v282_v35  ;;  %v4301_v50 = vcombine.low %v278_v34, %v282_v35  ;;  %v4210_v28 = vcombine.high %v184_v21, %v188_v22 }
  0xca   :  { %2732 = vmatpush1.bf16.msra.mxu0 %v4145_v29  ;;  %2763 = vmatprep.mubr.bf16.mxu0 %v5301_v42  ;;  %v290_v44 = vld [vmem:[#allocation5 + $0x560] sm:$0xff]  ;;  %v192_v29 = vld [vmem:[#allocation5 + $0x250] sm:$0xff]  ;;  %v4209_v35 = vcombine.low %v184_v21, %v188_v22  ;;  %v127_v22 = vld [vmem:[#allocation5 + $0x48] sm:$0xff] }
  0xcb   :  { %2733 = vmatprep.subr.bf16.mxu0 %v4154_v30  ;;  %v294_v51 = vld [vmem:[#allocation5 + $0x580] sm:$0xff]  ;;  %v4310_v53 = vcombine.high %v286_v43, %v290_v44  ;;  %v4309_v58 = vcombine.low %v286_v43, %v290_v44  ;;  %v196_v30 = vld [vmem:[#allocation5 + $0x270] sm:$0xff] }
  0xcc   :  { %2531 = vmatpush1.bf16.msra.mxu1 %v4285_v33  ;;  %v298_v52 = vld [vmem:[#allocation5 + $0x5a0] sm:$0xff]  ;;  %v4217_v44 = vcombine.low %v192_v29, %v196_v30 }
  0xcd   :  { %2532 = vmatprep.subr.bf16.mxu1 %v4294_v36  ;;  %v302_v59 = vld [vmem:[#allocation5 + $0x5c0] sm:$0xff]  ;;  %v4318_v61 = vcombine.high %v294_v51, %v298_v52  ;;  %v4317_v4 = vcombine.low %v294_v51, %v298_v52  ;;  %v4218_v36 = vcombine.high %v192_v29, %v196_v30  ;;  %v5331_v29 = vcombine.low %v5311_v9, %v5311_v9 }
  0xce   :  { %2734 = vmatpush1.bf16.msra.mxu0 %v4153_v0  ;;  %v306_v60 = vld [vmem:[#allocation5 + $0x5e0] sm:$0xff]  ;;  %v200_v0 = vld [vmem:[#allocation5 + $0x290] sm:$0xff] }
  0xcf   :  { %2735 = vmatprep.subr.bf16.mxu0 %v4162_v37  ;;  %v310_v5 = vld [vmem:[#allocation5 + $0x600] sm:$0xff]  ;;  %v4326_v7 = vcombine.high %v302_v59, %v306_v60  ;;  %v4325_v13 = vcombine.low %v302_v59, %v306_v60  ;;  %v204_v37 = vld [vmem:[#allocation5 + $0x2b0] sm:$0xff] }
  0xd0   :  { %2533 = vmatpush1.bf16.msra.mxu1 %v4293_v41  ;;  %v314_v6 = vld [vmem:[#allocation5 + $0x620] sm:$0xff]  ;;  %v4225_v52 = vcombine.low %v200_v0, %v204_v37 }
  0xd1   :  { %2534 = vmatprep.subr.bf16.mxu1 %v4302_v45  ;;  %v318_v14 = vld [vmem:[#allocation5 + $0x640] sm:$0xff]  ;;  %v4334_v17 = vcombine.high %v310_v5, %v314_v6  ;;  %v4333_v23 = vcombine.low %v310_v5, %v314_v6  ;;  %v4226_v45 = vcombine.high %v200_v0, %v204_v37  ;;  %v260_v0 = vld [vmem:[#allocation5 + $0x470] sm:$0xff] }
  0xd2   :  { %2736 = vmatpush1.bf16.msra.mxu0 %v4161_v46  ;;  %v322_v16 = vld [vmem:[#allocation5 + $0x660] sm:$0xff]  ;;  %v208_v46 = vld [vmem:[#allocation5 + $0x2d0] sm:$0xff] }
  0xd3   :  { %2737 = vmatprep.subr.bf16.mxu0 %v4170_v47  ;;  %v326_v24 = vld [vmem:[#allocation5 + $0x680] sm:$0xff]  ;;  %v4342_v25 = vcombine.high %v318_v14, %v322_v16  ;;  %v4341_v31 = vcombine.low %v318_v14, %v322_v16  ;;  %v212_v47 = vld [vmem:[#allocation5 + $0x2f0] sm:$0xff] }
  0xd4   :  { %2535 = vmatpush1.bf16.msra.mxu1 %v4301_v50  ;;  %v330_v39 = vld [vmem:[#allocation5 + $0x6a0] sm:$0xff]  ;;  %v4233_v60 = vcombine.low %v208_v46, %v212_v47 }
  0xd5   :  { %2536 = vmatprep.subr.bf16.mxu1 %v4310_v53  ;;  %v334_v32 = vld [vmem:[#allocation5 + $0x6c0] sm:$0xff]  ;;  %v4350_v34 = vcombine.high %v326_v24, %v330_v39  ;;  %v4349_v38 = vcombine.low %v326_v24, %v330_v39  ;;  %v4234_v53 = vcombine.high %v208_v46, %v212_v47 }
  0xd6   :  { %2738 = vmatpush1.bf16.msra.mxu0 %v4169_v54  ;;  %v338_v33 = vld [vmem:[#allocation5 + $0x6e0] sm:$0xff]  ;;  %v216_v54 = vld [vmem:[#allocation5 + $0x310] sm:$0xff] }
  0xd7   :  { %2739 = vmatprep.subr.bf16.mxu0 %v4178_v55  ;;  %v342_v40 = vld [vmem:[#allocation5 + $0x700] sm:$0xff]  ;;  %v4358_v43 = vcombine.high %v334_v32, %v338_v33  ;;  %v4357_v48 = vcombine.low %v334_v32, %v338_v33  ;;  %v220_v55 = vld [vmem:[#allocation5 + $0x330] sm:$0xff]  ;;  %v139_v32 = vld [vmem:[#allocation5 + $0xa8] sm:$0xff] }
  0xd8   :  { %2537 = vmatpush1.bf16.msra.mxu1 %v4309_v58  ;;  %v346_v41 = vld [vmem:[#allocation5 + $0x720] sm:$0xff]  ;;  %v4241_v6 = vcombine.low %v216_v54, %v220_v55 }
  0xd9   :  { %2538 = vmatprep.subr.bf16.mxu1 %v4318_v61  ;;  %v350_v49 = vld [vmem:[#allocation5 + $0x740] sm:$0xff]  ;;  %v4366_v51 = vcombine.high %v342_v40, %v346_v41  ;;  %v4365_v56 = vcombine.low %v342_v40, %v346_v41  ;;  %v4242_v61 = vcombine.high %v216_v54, %v220_v55  ;;  %v147_v40 = vld [vmem:[#allocation5 + $0xe8] sm:$0xff] }
  0xda   :  { %2740 = vmatpush1.bf16.msra.mxu0 %v4177_v62  ;;  %v354_v50 = vld [vmem:[#allocation5 + $0x760] sm:$0xff]  ;;  %v224_v62 = vld [vmem:[#allocation5 + $0x350] sm:$0xff] }
  0xdb   :  { %2741 = vmatprep.subr.bf16.mxu0 %v4186_v63  ;;  %v358_v57 = vld [vmem:[#allocation5 + $0x780] sm:$0xff]  ;;  %v4374_v59 = vcombine.high %v350_v49, %v354_v50  ;;  %v228_v63 = vld [vmem:[#allocation5 + $0x370] sm:$0xff]  ;;  %v4373_v1 = vcombine.low %v350_v49, %v354_v50  ;;  %v151_v49 = vld [vmem:[#allocation5 + $0x108] sm:$0xff] }
  0xdc   :  { %2539 = vmatpush1.bf16.msra.mxu1 %v4317_v4  ;;  %v362_v58 = vld [vmem:[#allocation5 + $0x7a0] sm:$0xff]  ;;  %v4249_v16 = vcombine.low %v224_v62, %v228_v63  ;;  %v155_v50 = vld [vmem:[#allocation5 + $0x128] sm:$0xff] }
  0xdd   :  { %2540 = vmatprep.subr.bf16.mxu1 %v4326_v7  ;;  %v366_v3 = vld [vmem:[#allocation5 + $0x7c0] sm:$0xff]  ;;  %v4382_v5 = vcombine.high %v358_v57, %v362_v58  ;;  %v4250_v7 = vcombine.high %v224_v62, %v228_v63  ;;  %v4381_v11 = vcombine.low %v358_v57, %v362_v58  ;;  %v4176_v55 = vcombine.high %v151_v49, %v155_v50  ;;  %v159_v57 = vld [vmem:[#allocation5 + $0x148] sm:$0xff] }
  0xde   :  { %2742 = vmatpush1.bf16.msra.mxu0 %v4185_v8  ;;  %v370_v4 = vld [vmem:[#allocation5 + $0x7e0] sm:$0xff]  ;;  %v232_v8 = vld [vmem:[#allocation5 + $0x390] sm:$0xff]  ;;  %v163_v58 = vld [vmem:[#allocation5 + $0x168] sm:$0xff]  ;;  %v4175_v62 = vcombine.low %v151_v49, %v155_v50 }
  0xdf   :  { %2743 = vmatprep.subr.bf16.mxu0 %v4194_v10  ;;  %v236_v10 = vld [vmem:[#allocation5 + $0x3b0] sm:$0xff]  ;;  %v4390_v14 = vcombine.high %v366_v3, %v370_v4  ;;  %v4389_v21 = vcombine.low %v366_v3, %v370_v4  ;;  %v4184_v63 = vcombine.high %v159_v57, %v163_v58  ;;  %v167_v3 = vld [vmem:[#allocation5 + $0x188] sm:$0xff] }
  0xe0   :  { %2541 = vmatpush1.bf16.msra.mxu1 %v4325_v13  ;;  %v123_v13 = vld [vmem:[#allocation5 + $0x28] sm:$0xff]  ;;  %v4257_v39 = vcombine.low %v232_v8, %v236_v10  ;;  %v328_v50 = vld [vmem:[#allocation5 + $0x690] sm:$0xff] }
  0xe1   :  { %2542 = vmatprep.subr.bf16.mxu1 %v4334_v17  ;;  %v4258_v17 = vcombine.high %v232_v8, %v236_v10  ;;  %v4144_v24 = vcombine.high %v119_v12, %v123_v13  ;;  %v4143_v30 = vcombine.low %v119_v12, %v123_v13  ;;  %v171_v4 = vld [vmem:[#allocation5 + $0x1a8] sm:$0xff]  ;;  %v4183_v8 = vcombine.low %v159_v57, %v163_v58  ;;  %v336_v58 = vld [vmem:[#allocation5 + $0x6d0] sm:$0xff] }
  0xe2   :  { %2744 = vmatpush1.bf16.msra.mxu0 %v4193_v18  ;;  %v240_v18 = vld [vmem:[#allocation5 + $0x3d0] sm:$0xff]  ;;  %v4192_v10 = vcombine.high %v167_v3, %v171_v4  ;;  %v175_v12 = vld [vmem:[#allocation5 + $0x1c8] sm:$0xff] }
  0xe3   :  { %2745 = vmatprep.subr.bf16.mxu0 %v4202_v20  ;;  %v244_v20 = vld [vmem:[#allocation5 + $0x3f0] sm:$0xff]  ;;  %v179_v13 = vld [vmem:[#allocation5 + $0x1e8] sm:$0xff] }
  0xe4   :  { %2543 = vmatpush1.bf16.msra.mxu1 %v4333_v23  ;;  %v131_v23 = vld [vmem:[#allocation5 + $0x68] sm:$0xff] }
  0xe5   :  { %2544 = vmatprep.subr.bf16.mxu1 %v4342_v25  ;;  %v4266_v25 = vcombine.high %v240_v18, %v244_v20  ;;  %v4152_v33 = vcombine.high %v127_v22, %v131_v23  ;;  %v4151_v37 = vcombine.low %v127_v22, %v131_v23  ;;  %v183_v22 = vld [vmem:[#allocation5 + $0x208] sm:$0xff] }
  0xe6   :  { %2746 = vmatpush1.bf16.msra.mxu0 %v4201_v26  ;;  %v248_v26 = vld [vmem:[#allocation5 + $0x410] sm:$0xff]  ;;  %v187_v23 = vld [vmem:[#allocation5 + $0x228] sm:$0xff] }
  0xe7   :  { %2747 = vmatprep.subr.bf16.mxu0 %v4210_v28  ;;  %v252_v28 = vld [vmem:[#allocation5 + $0x430] sm:$0xff] }
  0xe8   :  { %2545 = vmatpush1.bf16.msra.mxu1 %v4341_v31  ;;  %v135_v31 = vld [vmem:[#allocation5 + $0x88] sm:$0xff]  ;;  %v4273_v41 = vcombine.low %v248_v26, %v252_v28 }
  0xe9   :  { %2546 = vmatprep.subr.bf16.mxu1 %v4350_v34  ;;  %v4265_v34 = vcombine.low %v240_v18, %v244_v20  ;;  %v4160_v9 = vcombine.high %v135_v31, %v139_v32  ;;  %v4159_v46 = vcombine.low %v135_v31, %v139_v32  ;;  %v4191_v18 = vcombine.low %v167_v3, %v171_v4  ;;  %v191_v31 = vld [vmem:[#allocation5 + $0x248] sm:$0xff]  ;;  %v344_v4 = vld [vmem:[#allocation5 + $0x710] sm:$0xff] }
  0xea   :  { %2748 = vmatpush1.bf16.msra.mxu0 %v4209_v35  ;;  %v4274_v35 = vcombine.high %v248_v26, %v252_v28  ;;  %v4200_v20 = vcombine.high %v175_v12, %v179_v13  ;;  %v4199_v26 = vcombine.low %v175_v12, %v179_v13  ;;  %v4208_v28 = vcombine.high %v183_v22, %v187_v23  ;;  %v195_v32 = vld [vmem:[#allocation5 + $0x268] sm:$0xff]  ;;  %v352_v13 = vld [vmem:[#allocation5 + $0x750] sm:$0xff] }
  0xeb   :  { %2749 = vmatprep.subr.bf16.mxu0 %v4218_v36  ;;  %v256_v36 = vld [vmem:[#allocation5 + $0x450] sm:$0xff] }
  0xec   :  { %2547 = vmatpush1.bf16.msra.mxu1 %v4349_v38  ;;  %v143_v38 = vld [vmem:[#allocation5 + $0xc8] sm:$0xff] }
  0xed   :  { %2548 = vmatprep.subr.bf16.mxu1 %v4358_v43  ;;  %v4282_v43 = vcombine.high %v256_v36, %v260_v0  ;;  %v4168_v47 = vcombine.high %v143_v38, %v147_v40  ;;  %v4167_v54 = vcombine.low %v143_v38, %v147_v40  ;;  %v199_v38 = vld [vmem:[#allocation5 + $0x288] sm:$0xff] }
  0xee   :  { %2750 = vmatpush1.bf16.msra.mxu0 %v4217_v44  ;;  %v264_v44 = vld [vmem:[#allocation5 + $0x490] sm:$0xff]  ;;  %v203_v40 = vld [vmem:[#allocation5 + $0x2a8] sm:$0xff] }
  0xef   :  { %2751 = vmatprep.subr.bf16.mxu0 %v4226_v45  ;;  %v268_v45 = vld [vmem:[#allocation5 + $0x4b0] sm:$0xff] }
  0xf0   :  { %2549 = vmatpush1.bf16.msra.mxu1 %v4357_v48  ;;  %v4281_v48 = vcombine.low %v256_v36, %v260_v0  ;;  %v4207_v36 = vcombine.low %v183_v22, %v187_v23  ;;  %v4216_v0 = vcombine.high %v191_v31, %v195_v32  ;;  %v360_v23 = vld [vmem:[#allocation5 + $0x790] sm:$0xff] }
  0xf1   :  { %2550 = vmatprep.subr.bf16.mxu1 %v4366_v51  ;;  %v4290_v51 = vcombine.high %v264_v44, %v268_v45 }
  0xf2   :  { %2752 = vmatpush1.bf16.msra.mxu0 %v4225_v52  ;;  %v272_v52 = vld [vmem:[#allocation5 + $0x4d0] sm:$0xff] }
  0xf3   :  { %2753 = vmatprep.subr.bf16.mxu0 %v4234_v53  ;;  %v276_v53 = vld [vmem:[#allocation5 + $0x4f0] sm:$0xff] }
  0xf4   :  { %2551 = vmatpush1.bf16.msra.mxu1 %v4365_v56  ;;  %v4289_v56 = vcombine.low %v264_v44, %v268_v45  ;;  %v4215_v44 = vcombine.low %v191_v31, %v195_v32  ;;  %v4224_v45 = vcombine.high %v199_v38, %v203_v40  ;;  %v368_v32 = vld [vmem:[#allocation5 + $0x7d0] sm:$0xff] }
  0xf5   :  { %2552 = vmatprep.subr.bf16.mxu1 %v4374_v59  ;;  %v4298_v59 = vcombine.high %v272_v52, %v276_v53 }
  0xf6   :  { %2754 = vmatpush1.bf16.msra.mxu0 %v4233_v60  ;;  %v280_v60 = vld [vmem:[#allocation5 + $0x510] sm:$0xff] }
  0xf7   :  { %2755 = vmatprep.subr.bf16.mxu0 %v4242_v61  ;;  %v284_v61 = vld [vmem:[#allocation5 + $0x530] sm:$0xff] }
  0xf8   :  { %2553 = vmatpush1.bf16.msra.mxu1 %v4373_v1  ;;  %v4297_v1 = vcombine.low %v272_v52, %v276_v53  ;;  %v4223_v52 = vcombine.low %v199_v38, %v203_v40  ;;  %v376_v40 = vld [vmem:[#allocation5 + $0x810] sm:$0xff] }
  0xf9   :  { %2554 = vmatprep.subr.bf16.mxu1 %v4382_v5  ;;  %v4306_v5 = vcombine.high %v280_v60, %v284_v61 }
  0xfa   :  { %2756 = vmatpush1.bf16.msra.mxu0 %v4241_v6  ;;  %v288_v6 = vld [vmem:[#allocation5 + $0x550] sm:$0xff] }
  0xfb   :  { %2757 = vmatprep.subr.bf16.mxu0 %v4250_v7  ;;  %v292_v7 = vld [vmem:[#allocation5 + $0x570] sm:$0xff] }
  0xfc   :  { %2555 = vmatpush1.bf16.msra.mxu1 %v4381_v11  ;;  %v4305_v11 = vcombine.low %v280_v60, %v284_v61 }
  0xfd   :  { %2556 = vmatprep.subr.bf16.mxu1 %v4390_v14  ;;  %v4314_v14 = vcombine.high %v288_v6, %v292_v7 }
  0xfe   :  { %2758 = vmatpush1.bf16.msra.mxu0 %v4249_v16  ;;  %v296_v16 = vld [vmem:[#allocation5 + $0x590] sm:$0xff] }
  0xff   :  { %2759 = vmatprep.subr.bf16.mxu0 %v4258_v17  ;;  %v300_v17 = vld [vmem:[#allocation5 + $0x5b0] sm:$0xff] }
 0x100   :  { %2557 = vmatpush1.bf16.msra.mxu1 %v4389_v21  ;;  %v4313_v21 = vcombine.low %v288_v6, %v292_v7 }
 0x101   :  { %2608 = vmatprep.subr.bf16.mxu1 %v4144_v24  ;;  %v4322_v24 = vcombine.high %v296_v16, %v300_v17 }
 0x102   :  { %2760 = vmatpush1.bf16.msra.mxu0 %v4257_v39  ;;  %v304_v39 = vld [vmem:[#allocation5 + $0x5d0] sm:$0xff] }
 0x103   :  { %2761 = vmatprep.subr.bf16.mxu0 %v4266_v25  ;;  %2559 = vmatmul.mubr.bf16.vlgmr.msra.gmra.mrb[0].mxu1 %v5331_v29  ;;  %v308_v25 = vld [vmem:[#allocation5 + $0x5f0] sm:$0xff] }
 0x104   :  { %2609 = vmatpush1.bf16.msra.mxu1 %v4143_v30  ;;  %2640 = vmatprep.mubr.bf16.mxu1 %v5301_v42  ;;  %v4321_v30 = vcombine.low %v296_v16, %v300_v17 }
 0x105   :  { %2610 = vmatprep.subr.bf16.mxu1 %v4152_v33  ;;  %v4330_v33 = vcombine.high %v304_v39, %v308_v25 }
 0x106   :  { %2762 = vmatpush1.bf16.msra.mxu0 %v4265_v34  ;;  %v312_v34 = vld [vmem:[#allocation5 + $0x610] sm:$0xff] }
 0x107   :  { %2772 = vmatprep.subr.bf16.mxu0 %v4274_v35  ;;  %v316_v35 = vld [vmem:[#allocation5 + $0x630] sm:$0xff] }
 0x108   :  { %2611 = vmatpush1.bf16.msra.mxu1 %v4151_v37  ;;  %v4329_v37 = vcombine.low %v304_v39, %v308_v25 }
 0x109   :  { %2764 = vmatmul.mubr.bf16.vlgmr.msra.gmra.mrb[4].mxu0 %v5315_v15  ;;  %2612 = vmatprep.subr.bf16.mxu1 %v4160_v9  ;;  %v4338_v9 = vcombine.high %v312_v34, %v316_v35 }
 0x10a   :  { %2773 = vmatpush1.bf16.msra.mxu0 %v4273_v41  ;;  %2804 = vmatprep.mubr.bf16.mxu0 %v5319_v19  ;;  %v320_v41 = vld [vmem:[#allocation5 + $0x650] sm:$0xff] }
 0x10b   :  { %2774 = vmatprep.subr.bf16.mxu0 %v4282_v43  ;;  %v324_v43 = vld [vmem:[#allocation5 + $0x670] sm:$0xff] }
 0x10c   :  { %2613 = vmatpush1.bf16.msra.mxu1 %v4159_v46  ;;  %v4337_v46 = vcombine.low %v312_v34, %v316_v35  ;;  %v4346_v49 = vcombine.high %v320_v41, %v324_v43 }
 0x10d   :  { %2614 = vmatprep.subr.bf16.mxu1 %v4168_v47  ;;  %v207_v47 = vld [vmem:[#allocation5 + $0x2c8] sm:$0xff] }
 0x10e   :  { %2775 = vmatpush1.bf16.msra.mxu0 %v4281_v48  ;;  %v211_v48 = vld [vmem:[#allocation5 + $0x2e8] sm:$0xff] }
 0x10f   :  { %2776 = vmatprep.subr.bf16.mxu0 %v4290_v51  ;;  %v332_v51 = vld [vmem:[#allocation5 + $0x6b0] sm:$0xff]  ;;  %v4232_v53 = vcombine.high %v207_v47, %v211_v48  ;;  %v4231_v60 = vcombine.low %v207_v47, %v211_v48 }
 0x110   :  { %2615 = vmatpush1.bf16.msra.mxu1 %v4167_v54  ;;  %v4345_v54 = vcombine.low %v320_v41, %v324_v43  ;;  %v4354_v57 = vcombine.high %v328_v50, %v332_v51  ;;  %v384_v48 = vld [vmem:[#allocation5 + $0x850] sm:$0xff] }
 0x111   :  { %2616 = vmatprep.subr.bf16.mxu1 %v4176_v55  ;;  %v215_v55 = vld [vmem:[#allocation5 + $0x308] sm:$0xff] }
 0x112   :  { %2777 = vmatpush1.bf16.msra.mxu0 %v4289_v56  ;;  %v219_v56 = vld [vmem:[#allocation5 + $0x328] sm:$0xff] }
 0x113   :  { %2778 = vmatprep.subr.bf16.mxu0 %v4298_v59  ;;  %v340_v59 = vld [vmem:[#allocation5 + $0x6f0] sm:$0xff]  ;;  %v4240_v61 = vcombine.high %v215_v55, %v219_v56  ;;  %v4239_v6 = vcombine.low %v215_v55, %v219_v56 }
 0x114   :  { %2617 = vmatpush1.bf16.msra.mxu1 %v4175_v62  ;;  %v4353_v62 = vcombine.low %v328_v50, %v332_v51  ;;  %v4362_v3 = vcombine.high %v336_v58, %v340_v59  ;;  %v392_v56 = vld [vmem:[#allocation5 + $0x890] sm:$0xff] }
 0x115   :  { %2618 = vmatprep.subr.bf16.mxu1 %v4184_v63  ;;  %v223_v63 = vld [vmem:[#allocation5 + $0x348] sm:$0xff] }
 0x116   :  { %2779 = vmatpush1.bf16.msra.mxu0 %v4297_v1  ;;  %v227_v1 = vld [vmem:[#allocation5 + $0x368] sm:$0xff] }
 0x117   :  { %2780 = vmatprep.subr.bf16.mxu0 %v4306_v5  ;;  %v348_v5 = vld [vmem:[#allocation5 + $0x730] sm:$0xff]  ;;  %v4248_v7 = vcombine.high %v223_v63, %v227_v1  ;;  %v4247_v16 = vcombine.low %v223_v63, %v227_v1 }
 0x118   :  { %2619 = vmatpush1.bf16.msra.mxu1 %v4183_v8  ;;  %v4361_v8 = vcombine.low %v336_v58, %v340_v59  ;;  %v4370_v12 = vcombine.high %v344_v4, %v348_v5  ;;  %v400_v1 = vld [vmem:[#allocation5 + $0x8d0] sm:$0xff] }
 0x119   :  { %2620 = vmatprep.subr.bf16.mxu1 %v4192_v10  ;;  %v231_v10 = vld [vmem:[#allocation5 + $0x388] sm:$0xff] }
 0x11a   :  { %2781 = vmatpush1.bf16.msra.mxu0 %v4305_v11  ;;  %v235_v11 = vld [vmem:[#allocation5 + $0x3a8] sm:$0xff] }
 0x11b   :  { %2782 = vmatprep.subr.bf16.mxu0 %v4314_v14  ;;  %v356_v14 = vld [vmem:[#allocation5 + $0x770] sm:$0xff]  ;;  %v4256_v17 = vcombine.high %v231_v10, %v235_v11  ;;  %v4255_v39 = vcombine.low %v231_v10, %v235_v11 }
 0x11c   :  { %2621 = vmatpush1.bf16.msra.mxu1 %v4191_v18  ;;  %v4369_v18 = vcombine.low %v344_v4, %v348_v5  ;;  %v4378_v22 = vcombine.high %v352_v13, %v356_v14  ;;  %v408_v11 = vld [vmem:[#allocation5 + $0x910] sm:$0xff] }
 0x11d   :  { %2622 = vmatprep.subr.bf16.mxu1 %v4200_v20  ;;  %v239_v20 = vld [vmem:[#allocation5 + $0x3c8] sm:$0xff] }
 0x11e   :  { %2783 = vmatpush1.bf16.msra.mxu0 %v4313_v21  ;;  %v243_v21 = vld [vmem:[#allocation5 + $0x3e8] sm:$0xff] }
 0x11f   :  { %2784 = vmatprep.subr.bf16.mxu0 %v4322_v24  ;;  %v364_v24 = vld [vmem:[#allocation5 + $0x7b0] sm:$0xff]  ;;  %v4264_v25 = vcombine.high %v239_v20, %v243_v21  ;;  %v4263_v34 = vcombine.low %v239_v20, %v243_v21 }
 0x120   :  { %2623 = vmatpush1.bf16.msra.mxu1 %v4199_v26  ;;  %v4377_v26 = vcombine.low %v352_v13, %v356_v14  ;;  %v4386_v31 = vcombine.high %v360_v23, %v364_v24  ;;  %v416_v21 = vld [vmem:[#allocation5 + $0x950] sm:$0xff] }
 0x121   :  { %2624 = vmatprep.subr.bf16.mxu1 %v4208_v28  ;;  %v247_v28 = vld [vmem:[#allocation5 + $0x408] sm:$0xff] }
 0x122   :  { %2785 = vmatpush1.bf16.msra.mxu0 %v4321_v30  ;;  %v251_v30 = vld [vmem:[#allocation5 + $0x428] sm:$0xff] }
 0x123   :  { %2786 = vmatprep.subr.bf16.mxu0 %v4330_v33  ;;  %v372_v33 = vld [vmem:[#allocation5 + $0x7f0] sm:$0xff]  ;;  %v4272_v35 = vcombine.high %v247_v28, %v251_v30  ;;  %v4271_v41 = vcombine.low %v247_v28, %v251_v30 }
 0x124   :  { %2625 = vmatpush1.bf16.msra.mxu1 %v4207_v36  ;;  %v4385_v36 = vcombine.low %v360_v23, %v364_v24  ;;  %v4394_v38 = vcombine.high %v368_v32, %v372_v33  ;;  %v424_v30 = vld [vmem:[#allocation5 + $0x990] sm:$0xff] }
 0x125   :  { %2626 = vmatprep.subr.bf16.mxu1 %v4216_v0  ;;  %v255_v0 = vld [vmem:[#allocation5 + $0x448] sm:$0xff] }
 0x126   :  { %2787 = vmatpush1.bf16.msra.mxu0 %v4329_v37  ;;  %v259_v37 = vld [vmem:[#allocation5 + $0x468] sm:$0xff] }
 0x127   :  { %2788 = vmatprep.subr.bf16.mxu0 %v4338_v9  ;;  %v380_v9 = vld [vmem:[#allocation5 + $0x830] sm:$0xff]  ;;  %v4280_v43 = vcombine.high %v255_v0, %v259_v37  ;;  %v4279_v50 = vcombine.low %v255_v0, %v259_v37 }
 0x128   :  { %2627 = vmatpush1.bf16.msra.mxu1 %v4215_v44  ;;  %v4393_v44 = vcombine.low %v368_v32, %v372_v33  ;;  %v4402_v47 = vcombine.high %v376_v40, %v380_v9  ;;  %v432_v37 = vld [vmem:[#allocation5 + $0x9d0] sm:$0xff] }
 0x129   :  { %2628 = vmatprep.subr.bf16.mxu1 %v4224_v45  ;;  %v263_v45 = vld [vmem:[#allocation5 + $0x488] sm:$0xff] }
 0x12a   :  { %2789 = vmatpush1.bf16.msra.mxu0 %v4337_v46  ;;  %v267_v46 = vld [vmem:[#allocation5 + $0x4a8] sm:$0xff] }
 0x12b   :  { %2790 = vmatprep.subr.bf16.mxu0 %v4346_v49  ;;  %v388_v49 = vld [vmem:[#allocation5 + $0x870] sm:$0xff]  ;;  %v4288_v51 = vcombine.high %v263_v45, %v267_v46  ;;  %v4287_v58 = vcombine.low %v263_v45, %v267_v46 }
 0x12c   :  { %2629 = vmatpush1.bf16.msra.mxu1 %v4223_v52  ;;  %v4401_v52 = vcombine.low %v376_v40, %v380_v9  ;;  %v4410_v55 = vcombine.high %v384_v48, %v388_v49  ;;  %v440_v46 = vld [vmem:[#allocation5 + $0xa10] sm:$0xff] }
 0x12d   :  { %2630 = vmatprep.subr.bf16.mxu1 %v4232_v53  ;;  %v271_v53 = vld [vmem:[#allocation5 + $0x4c8] sm:$0xff] }
 0x12e   :  { %2791 = vmatpush1.bf16.msra.mxu0 %v4345_v54  ;;  %v275_v54 = vld [vmem:[#allocation5 + $0x4e8] sm:$0xff] }
 0x12f   :  { %2792 = vmatprep.subr.bf16.mxu0 %v4354_v57  ;;  %v396_v57 = vld [vmem:[#allocation5 + $0x8b0] sm:$0xff]  ;;  %v4296_v59 = vcombine.high %v271_v53, %v275_v54  ;;  %v4295_v4 = vcombine.low %v271_v53, %v275_v54 }
 0x130   :  { %2631 = vmatpush1.bf16.msra.mxu1 %v4231_v60  ;;  %v4409_v60 = vcombine.low %v384_v48, %v388_v49  ;;  %v4418_v63 = vcombine.high %v392_v56, %v396_v57  ;;  %v448_v54 = vld [vmem:[#allocation5 + $0xa50] sm:$0xff] }
 0x131   :  { %2632 = vmatprep.subr.bf16.mxu1 %v4240_v61  ;;  %v279_v61 = vld [vmem:[#allocation5 + $0x508] sm:$0xff] }
 0x132   :  { %2793 = vmatpush1.bf16.msra.mxu0 %v4353_v62  ;;  %v283_v62 = vld [vmem:[#allocation5 + $0x528] sm:$0xff] }
 0x133   :  { %2794 = vmatprep.subr.bf16.mxu0 %v4362_v3  ;;  %v404_v3 = vld [vmem:[#allocation5 + $0x8f0] sm:$0xff]  ;;  %v4304_v5 = vcombine.high %v279_v61, %v283_v62  ;;  %v4303_v13 = vcombine.low %v279_v61, %v283_v62 }
 0x134   :  { %2633 = vmatpush1.bf16.msra.mxu1 %v4239_v6  ;;  %v4417_v6 = vcombine.low %v392_v56, %v396_v57  ;;  %v4426_v10 = vcombine.high %v400_v1, %v404_v3  ;;  %v456_v62 = vld [vmem:[#allocation5 + $0xa90] sm:$0xff] }
 0x135   :  { %2634 = vmatprep.subr.bf16.mxu1 %v4248_v7  ;;  %v287_v7 = vld [vmem:[#allocation5 + $0x548] sm:$0xff] }
 0x136   :  { %2795 = vmatpush1.bf16.msra.mxu0 %v4361_v8  ;;  %v291_v8 = vld [vmem:[#allocation5 + $0x568] sm:$0xff] }
 0x137   :  { %2796 = vmatprep.subr.bf16.mxu0 %v4370_v12  ;;  %v412_v12 = vld [vmem:[#allocation5 + $0x930] sm:$0xff]  ;;  %v4312_v14 = vcombine.high %v287_v7, %v291_v8  ;;  %v4311_v23 = vcombine.low %v287_v7, %v291_v8 }
 0x138   :  { %2635 = vmatpush1.bf16.msra.mxu1 %v4247_v16  ;;  %v4425_v16 = vcombine.low %v400_v1, %v404_v3  ;;  %v4434_v20 = vcombine.high %v408_v11, %v412_v12  ;;  %v464_v8 = vld [vmem:[#allocation5 + $0xad0] sm:$0xff] }
 0x139   :  { %2636 = vmatprep.subr.bf16.mxu1 %v4256_v17  ;;  %v295_v17 = vld [vmem:[#allocation5 + $0x588] sm:$0xff] }
 0x13a   :  { %2797 = vmatpush1.bf16.msra.mxu0 %v4369_v18  ;;  %v299_v18 = vld [vmem:[#allocation5 + $0x5a8] sm:$0xff] }
 0x13b   :  { %2798 = vmatprep.subr.bf16.mxu0 %v4378_v22  ;;  %v420_v22 = vld [vmem:[#allocation5 + $0x970] sm:$0xff]  ;;  %v4320_v24 = vcombine.high %v295_v17, %v299_v18  ;;  %v4319_v32 = vcombine.low %v295_v17, %v299_v18 }
 0x13c   :  { %2637 = vmatpush1.bf16.msra.mxu1 %v4255_v39  ;;  %v4433_v39 = vcombine.low %v408_v11, %v412_v12  ;;  %v4442_v28 = vcombine.high %v416_v21, %v420_v22  ;;  %v472_v18 = vld [vmem:[#allocation5 + $0xb10] sm:$0xff] }
 0x13d   :  { %2638 = vmatprep.subr.bf16.mxu1 %v4264_v25  ;;  %v303_v25 = vld [vmem:[#allocation5 + $0x5c8] sm:$0xff] }
 0x13e   :  { %2799 = vmatpush1.bf16.msra.mxu0 %v4377_v26  ;;  %v307_v26 = vld [vmem:[#allocation5 + $0x5e8] sm:$0xff] }
 0x13f   :  { %2800 = vmatprep.subr.bf16.mxu0 %v4386_v31  ;;  %v428_v31 = vld [vmem:[#allocation5 + $0x9b0] sm:$0xff]  ;;  %v4328_v33 = vcombine.high %v303_v25, %v307_v26  ;;  %v4327_v40 = vcombine.low %v303_v25, %v307_v26 }
 0x140   :  { %2639 = vmatpush1.bf16.msra.mxu1 %v4263_v34  ;;  %v4441_v34 = vcombine.low %v416_v21, %v420_v22  ;;  %v4450_v0 = vcombine.high %v424_v30, %v428_v31  ;;  %v480_v26 = vld [vmem:[#allocation5 + $0xb50] sm:$0xff] }
 0x141   :  { %2649 = vmatprep.subr.bf16.mxu1 %v4272_v35  ;;  %v311_v35 = vld [vmem:[#allocation5 + $0x608] sm:$0xff] }
 0x142   :  { %2801 = vmatpush1.bf16.msra.mxu0 %v4385_v36  ;;  %v315_v36 = vld [vmem:[#allocation5 + $0x628] sm:$0xff] }
 0x143   :  { %2802 = vmatprep.subr.bf16.mxu0 %v4394_v38  ;;  %2641 = vmatmul.mubr.bf16.vlgmr.msra.gmra.mrb[4].mxu1 %v5315_v15  ;;  %v436_v38 = vld [vmem:[#allocation5 + $0x9f0] sm:$0xff]  ;;  %v4336_v9 = vcombine.high %v311_v35, %v315_v36  ;;  %v4335_v48 = vcombine.low %v311_v35, %v315_v36 }
 0x144   :  { %2650 = vmatpush1.bf16.msra.mxu1 %v4271_v41  ;;  %2681 = vmatprep.mubr.bf16.mxu1 %v5319_v19  ;;  %v4449_v41 = vcombine.low %v424_v30, %v428_v31  ;;  %v4458_v45 = vcombine.high %v432_v37, %v436_v38  ;;  %v488_v36 = vld [vmem:[#allocation5 + $0xb90] sm:$0xff] }
 0x145   :  { %2651 = vmatprep.subr.bf16.mxu1 %v4280_v43  ;;  %v319_v43 = vld [vmem:[#allocation5 + $0x648] sm:$0xff] }
 0x146   :  { %2803 = vmatpush1.bf16.msra.mxu0 %v4393_v44  ;;  %v323_v44 = vld [vmem:[#allocation5 + $0x668] sm:$0xff] }
 0x147   :  { %2813 = vmatprep.subr.bf16.mxu0 %v4402_v47  ;;  %v444_v47 = vld [vmem:[#allocation5 + $0xa30] sm:$0xff]  ;;  %v4344_v49 = vcombine.high %v319_v43, %v323_v44  ;;  %v4343_v56 = vcombine.low %v319_v43, %v323_v44 }
 0x148   :  { %2652 = vmatpush1.bf16.msra.mxu1 %v4279_v50  ;;  %v4457_v50 = vcombine.low %v432_v37, %v436_v38  ;;  %v4466_v53 = vcombine.high %v440_v46, %v444_v47  ;;  %v496_v44 = vld [vmem:[#allocation5 + $0xbd0] sm:$0xff] }
 0x149   :  { %2805 = vmatmul.mubr.bf16.vlgmr.msra.gmra.mrb[4].mxu0 %v5331_v29  ;;  %2653 = vmatprep.subr.bf16.mxu1 %v4288_v51  ;;  %v327_v51 = vld [vmem:[#allocation5 + $0x688] sm:$0xff] }
 0x14a   :  { %2814 = vmatpush1.bf16.msra.mxu0 %v4401_v52  ;;  %2845 = vmatprep.mubr.bf16.mxu0 %v5308_v2  ;;  %v331_v52 = vld [vmem:[#allocation5 + $0x6a8] sm:$0xff] }
 0x14b   :  { %2815 = vmatprep.subr.bf16.mxu0 %v4410_v55  ;;  %v452_v55 = vld [vmem:[#allocation5 + $0xa70] sm:$0xff]  ;;  %v4352_v57 = vcombine.high %v327_v51, %v331_v52  ;;  %v4351_v1 = vcombine.low %v327_v51, %v331_v52 }
 0x14c   :  { %2654 = vmatpush1.bf16.msra.mxu1 %v4287_v58  ;;  %v4465_v58 = vcombine.low %v440_v46, %v444_v47  ;;  %v4474_v61 = vcombine.high %v448_v54, %v452_v55 }
 0x14d   :  { %2655 = vmatprep.subr.bf16.mxu1 %v4296_v59  ;;  %v335_v59 = vld [vmem:[#allocation5 + $0x6c8] sm:$0xff] }
 0x14e   :  { %2816 = vmatpush1.bf16.msra.mxu0 %v4409_v60  ;;  %v339_v60 = vld [vmem:[#allocation5 + $0x6e8] sm:$0xff] }
 0x14f   :  { %2817 = vmatprep.subr.bf16.mxu0 %v4418_v63  ;;  %v460_v63 = vld [vmem:[#allocation5 + $0xab0] sm:$0xff]  ;;  %v4360_v3 = vcombine.high %v335_v59, %v339_v60  ;;  %v4359_v11 = vcombine.low %v335_v59, %v339_v60 }
 0x150   :  { %2656 = vmatpush1.bf16.msra.mxu1 %v4295_v4  ;;  %v4473_v4 = vcombine.low %v448_v54, %v452_v55  ;;  %v4482_v7 = vcombine.high %v456_v62, %v460_v63  ;;  %v391_v55 = vld [vmem:[#allocation5 + $0x888] sm:$0xff] }
 0x151   :  { %2657 = vmatprep.subr.bf16.mxu1 %v4304_v5  ;;  %v343_v5 = vld [vmem:[#allocation5 + $0x708] sm:$0xff] }
 0x152   :  { %2818 = vmatpush1.bf16.msra.mxu0 %v4417_v6  ;;  %v347_v6 = vld [vmem:[#allocation5 + $0x728] sm:$0xff] }
 0x153   :  { %2819 = vmatprep.subr.bf16.mxu0 %v4426_v10  ;;  %v468_v10 = vld [vmem:[#allocation5 + $0xaf0] sm:$0xff]  ;;  %v4368_v12 = vcombine.high %v343_v5, %v347_v6  ;;  %v4367_v21 = vcombine.low %v343_v5, %v347_v6  ;;  %v407_v5 = vld [vmem:[#allocation5 + $0x908] sm:$0xff] }
 0x154   :  { %2658 = vmatpush1.bf16.msra.mxu1 %v4303_v13  ;;  %v4481_v13 = vcombine.low %v456_v62, %v460_v63  ;;  %v4490_v17 = vcombine.high %v464_v8, %v468_v10  ;;  %v4764_v60 = vld [vmem:[#allocation8] ss:$8 sps:$4 sm:$0xff]   ;;  %v4769_v63 = vld [vmem:[#allocation8 + $0x14] ss:$8 sps:$4 sm:$0xff]  }
 0x155   :  { %2659 = vmatprep.subr.bf16.mxu1 %v4312_v14  ;;  %v351_v14 = vld [vmem:[#allocation5 + $0x748] sm:$0xff] }
 0x156   :  { %2820 = vmatpush1.bf16.msra.mxu0 %v4425_v16  ;;  %v355_v16 = vld [vmem:[#allocation5 + $0x768] sm:$0xff] }
 0x157   :  { %2821 = vmatprep.subr.bf16.mxu0 %v4434_v20  ;;  %v476_v20 = vld [vmem:[#allocation5 + $0xb30] sm:$0xff]  ;;  %v4376_v22 = vcombine.high %v351_v14, %v355_v16  ;;  %v4375_v30 = vcombine.low %v351_v14, %v355_v16  ;;  %v403_v62 = vld [vmem:[#allocation5 + $0x8e8] sm:$0xff]  ;;  %v4775_v14 = vld [vmem:[#allocation8 + $0x34] ss:$8 sps:$4 sm:$0xff]  }
 0x158   :  { %2660 = vmatpush1.bf16.msra.mxu1 %v4311_v23  ;;  %v4489_v23 = vcombine.low %v464_v8, %v468_v10  ;;  %v4498_v25 = vcombine.high %v472_v18, %v476_v20  ;;  %v411_v6 = vld [vmem:[#allocation5 + $0x928] sm:$0xff] }
 0x159   :  { %2661 = vmatprep.subr.bf16.mxu1 %v4320_v24  ;;  %v359_v24 = vld [vmem:[#allocation5 + $0x788] sm:$0xff]  ;;  %v4432_v10 = vcombine.high %v407_v5, %v411_v6  ;;  %v4431_v16 = vcombine.low %v407_v5, %v411_v6 }
 0x15a   :  { %2822 = vmatpush1.bf16.msra.mxu0 %v4433_v39  ;;  %v363_v39 = vld [vmem:[#allocation5 + $0x7a8] sm:$0xff] }
 0x15b   :  { %2823 = vmatprep.subr.bf16.mxu0 %v4442_v28  ;;  %v484_v28 = vld [vmem:[#allocation5 + $0xb70] sm:$0xff]  ;;  %v4384_v31 = vcombine.high %v359_v24, %v363_v39  ;;  %v4383_v37 = vcombine.low %v359_v24, %v363_v39  ;;  %v479_v5 = vld [vmem:[#allocation5 + $0xb48] sm:$0xff] }
 0x15c   :  { %2662 = vmatpush1.bf16.msra.mxu1 %v4319_v32  ;;  %v4497_v32 = vcombine.low %v472_v18, %v476_v20  ;;  %v4506_v35 = vcombine.high %v480_v26, %v484_v28  ;;  %v4773_v18 = vld [vmem:[#allocation8 + $0x30] ss:$8 sps:$4 sm:$0xff]   ;;  %v423_v20 = vld [vmem:[#allocation5 + $0x988] sm:$0xff] }
 0x15d   :  { %2663 = vmatprep.subr.bf16.mxu1 %v4328_v33  ;;  %v367_v33 = vld [vmem:[#allocation5 + $0x7c8] sm:$0xff] }
 0x15e   :  { %2824 = vmatpush1.bf16.msra.mxu0 %v4441_v34  ;;  %v371_v34 = vld [vmem:[#allocation5 + $0x7e8] sm:$0xff] }
 0x15f   :  { %2825 = vmatprep.subr.bf16.mxu0 %v4450_v0  ;;  %v492_v0 = vld [vmem:[#allocation5 + $0xbb0] sm:$0xff]  ;;  %v4392_v38 = vcombine.high %v367_v33, %v371_v34  ;;  %v4391_v46 = vcombine.low %v367_v33, %v371_v34  ;;  %v439_v33 = vld [vmem:[#allocation5 + $0xa08] sm:$0xff] }
 0x160   :  { %2664 = vmatpush1.bf16.msra.mxu1 %v4327_v40  ;;  %v4505_v40 = vcombine.low %v480_v26, %v484_v28  ;;  %v4514_v43 = vcombine.high %v488_v36, %v492_v0  ;;  %v4776_v39 = vld [vmem:[#allocation8 + $0x40] ss:$8 sps:$4 sm:$0xff]   ;;  %v4781_v28 = vld [vmem:[#allocation8 + $0x54] ss:$8 sps:$4 sm:$0xff]  }
 0x161   :  { %2665 = vmatprep.subr.bf16.mxu1 %v4336_v9  ;;  %v375_v9 = vld [vmem:[#allocation5 + $0x808] sm:$0xff] }
 0x162   :  { %2826 = vmatpush1.bf16.msra.mxu0 %v4449_v41  ;;  %v379_v41 = vld [vmem:[#allocation5 + $0x828] sm:$0xff] }
 0x163   :  { %2827 = vmatprep.subr.bf16.mxu0 %v4458_v45  ;;  %v500_v45 = vld [vmem:[#allocation5 + $0xbf0] sm:$0xff]  ;;  %v4400_v47 = vcombine.high %v375_v9, %v379_v41  ;;  %v4399_v52 = vcombine.low %v375_v9, %v379_v41  ;;  %v435_v26 = vld [vmem:[#allocation5 + $0x9e8] sm:$0xff] }
 0x164   :  { %2666 = vmatpush1.bf16.msra.mxu1 %v4335_v48  ;;  %v4513_v48 = vcombine.low %v488_v36, %v492_v0  ;;  %v4522_v51 = vcombine.high %v496_v44, %v500_v45  ;;  %v4521_v54 = vcombine.low %v496_v44, %v500_v45  ;;  %v443_v34 = vld [vmem:[#allocation5 + $0xa28] sm:$0xff]  ;;  %v4787_v44 = vld [vmem:[#allocation8 + $0x74] ss:$8 sps:$4 sm:$0xff]  }
 0x165   :  { %2667 = vmatprep.subr.bf16.mxu1 %v4344_v49  ;;  %v383_v49 = vld [vmem:[#allocation5 + $0x848] sm:$0xff] }
 0x166   :  { %2828 = vmatpush1.bf16.msra.mxu0 %v4457_v50  ;;  %v387_v50 = vld [vmem:[#allocation5 + $0x868] sm:$0xff] }
 0x167   :  { %2829 = vmatprep.subr.bf16.mxu0 %v4466_v53  ;;  %v4408_v53 = vcombine.high %v383_v49, %v387_v50  ;;  %v447_v41 = vld [vmem:[#allocation5 + $0xa48] sm:$0xff] }
 0x168   :  { %2668 = vmatpush1.bf16.msra.mxu1 %v4343_v56  ;;  %v395_v56 = vld [vmem:[#allocation5 + $0x8a8] sm:$0xff] }
 0x169   :  { %2669 = vmatprep.subr.bf16.mxu1 %v4352_v57  ;;  %v4766_v57 = vld [vmem:[#allocation8 + $0x4] ss:$8 sps:$4 sm:$0xff]   ;;  %v4416_v59 = vcombine.high %v391_v55, %v395_v56 }
 0x16a   :  { %2830 = vmatpush1.bf16.msra.mxu0 %v4465_v58  ;;  %v4407_v58 = vcombine.low %v383_v49, %v387_v50  ;;  %v455_v49 = vld [vmem:[#allocation5 + $0xa88] sm:$0xff] }
 0x16b   :  { %2831 = vmatprep.subr.bf16.mxu0 %v4474_v61  ;;  %v399_v61 = vld [vmem:[#allocation5 + $0x8c8] sm:$0xff] }
 0x16c   :  { %2670 = vmatpush1.bf16.msra.mxu1 %v4351_v1  ;;  %v4415_v1 = vcombine.low %v391_v55, %v395_v56  ;;  %v4423_v8 = vcombine.low %v399_v61, %v403_v62  ;;  %v459_v50 = vld [vmem:[#allocation5 + $0xaa8] sm:$0xff] }
 0x16d   :  { %2671 = vmatprep.subr.bf16.mxu1 %v4360_v3  ;;  %v4424_v3 = vcombine.high %v399_v61, %v403_v62  ;;  %v463_v55 = vld [vmem:[#allocation5 + $0xac8] sm:$0xff] }
 0x16e   :  { %2832 = vmatpush1.bf16.msra.mxu0 %v4473_v4  ;;  %v4767_v4 = vld [vmem:[#allocation8 + $0x10] ss:$8 sps:$4 sm:$0xff]   ;;  %v467_v56 = vld [vmem:[#allocation5 + $0xae8] sm:$0xff] }
 0x16f   :  { %2833 = vmatprep.subr.bf16.mxu0 %v4482_v7  ;;  %v4772_v7 = vld [vmem:[#allocation8 + $0x24] ss:$8 sps:$4 sm:$0xff]  }
 0x170   :  { %2672 = vmatpush1.bf16.msra.mxu1 %v4359_v11  ;;  %v4770_v11 = vld [vmem:[#allocation8 + $0x20] ss:$8 sps:$4 sm:$0xff]  }
 0x171   :  { %2673 = vmatprep.subr.bf16.mxu1 %v4368_v12  ;;  %v415_v12 = vld [vmem:[#allocation5 + $0x948] sm:$0xff] }
 0x172   :  { %2834 = vmatpush1.bf16.msra.mxu0 %v4481_v13  ;;  %v419_v13 = vld [vmem:[#allocation5 + $0x968] sm:$0xff] }
 0x173   :  { %2835 = vmatprep.subr.bf16.mxu0 %v4490_v17  ;;  %v4440_v17 = vcombine.high %v415_v12, %v419_v13  ;;  %v471_v61 = vld [vmem:[#allocation5 + $0xb08] sm:$0xff] }
 0x174   :  { %2674 = vmatpush1.bf16.msra.mxu1 %v4367_v21  ;;  %v427_v21 = vld [vmem:[#allocation5 + $0x9a8] sm:$0xff] }
 0x175   :  { %2675 = vmatprep.subr.bf16.mxu1 %v4376_v22  ;;  %v4778_v22 = vld [vmem:[#allocation8 + $0x44] ss:$8 sps:$4 sm:$0xff]   ;;  %v4448_v24 = vcombine.high %v423_v20, %v427_v21 }
 0x176   :  { %2836 = vmatpush1.bf16.msra.mxu0 %v4489_v23  ;;  %v4439_v23 = vcombine.low %v415_v12, %v419_v13  ;;  %v475_v62 = vld [vmem:[#allocation5 + $0xb28] sm:$0xff] }
 0x177   :  { %2837 = vmatprep.subr.bf16.mxu0 %v4498_v25  ;;  %v431_v25 = vld [vmem:[#allocation5 + $0x9c8] sm:$0xff] }
 0x178   :  { %2676 = vmatpush1.bf16.msra.mxu1 %v4375_v30  ;;  %v4447_v30 = vcombine.low %v423_v20, %v427_v21  ;;  %v4455_v0 = vcombine.low %v431_v25, %v435_v26  ;;  %v483_v6 = vld [vmem:[#allocation5 + $0xb68] sm:$0xff] }
 0x179   :  { %2677 = vmatprep.subr.bf16.mxu1 %v4384_v31  ;;  %v4456_v31 = vcombine.high %v431_v25, %v435_v26  ;;  %v487_v12 = vld [vmem:[#allocation5 + $0xb88] sm:$0xff]  ;;  %v121_v25 = vld [vmem:[#allocation5 + $0x18] sm:$0xff] }
 0x17a   :  { %2838 = vmatpush1.bf16.msra.mxu0 %v4497_v32  ;;  %v4779_v32 = vld [vmem:[#allocation8 + $0x50] ss:$8 sps:$4 sm:$0xff]   ;;  %v491_v13 = vld [vmem:[#allocation5 + $0xba8] sm:$0xff] }
 0x17b   :  { %2839 = vmatprep.subr.bf16.mxu0 %v4506_v35  ;;  %v4784_v35 = vld [vmem:[#allocation8 + $0x64] ss:$8 sps:$4 sm:$0xff]   ;;  %v125_v26 = vld [vmem:[#allocation5 + $0x38] sm:$0xff] }
 0x17c   :  { %2678 = vmatpush1.bf16.msra.mxu1 %v4383_v37  ;;  %v495_v20 = vld [vmem:[#allocation5 + $0xbc8] sm:$0xff] }
 0x17d   :  { %2679 = vmatprep.subr.bf16.mxu1 %v4392_v38  ;;  %v4464_v38 = vcombine.high %v439_v33, %v443_v34  ;;  %v499_v21 = vld [vmem:[#allocation5 + $0xbe8] sm:$0xff] }
 0x17e   :  { %2840 = vmatpush1.bf16.msra.mxu0 %v4505_v40  ;;  %v4782_v40 = vld [vmem:[#allocation8 + $0x60] ss:$8 sps:$4 sm:$0xff]  }
 0x17f   :  { %2841 = vmatprep.subr.bf16.mxu0 %v4514_v43  ;;  %v451_v43 = vld [vmem:[#allocation5 + $0xa68] sm:$0xff] }
 0x180   :  { %2680 = vmatpush1.bf16.msra.mxu1 %v4391_v46  ;;  %v4463_v46 = vcombine.low %v439_v33, %v443_v34  ;;  %v129_v33 = vld [vmem:[#allocation5 + $0x58] sm:$0xff] }
 0x181   :  { %2690 = vmatprep.subr.bf16.mxu1 %v4400_v47  ;;  %v4472_v47 = vcombine.high %v447_v41, %v451_v43  ;;  %v133_v34 = vld [vmem:[#allocation5 + $0x78] sm:$0xff] }
 0x182   :  { %2842 = vmatpush1.bf16.msra.mxu0 %v4513_v48  ;;  %v4785_v48 = vld [vmem:[#allocation8 + $0x70] ss:$8 sps:$4 sm:$0xff]  }
 0x183   :  { %2843 = vmatprep.subr.bf16.mxu0 %v4522_v51  ;;  %2682 = vmatmul.mubr.bf16.vlgmr.msra.gmra.mrb[4].mxu1 %v5331_v29  ;;  %v4790_v51 = vld [vmem:[#allocation8 + $0x84] ss:$8 sps:$4 sm:$0xff]  }
 0x184   :  { %2691 = vmatpush1.bf16.msra.mxu1 %v4399_v52  ;;  %2722 = vmatprep.mubr.bf16.mxu1 %v5308_v2  ;;  %v4471_v52 = vcombine.low %v447_v41, %v451_v43  ;;  %v141_v41 = vld [vmem:[#allocation5 + $0xb8] sm:$0xff]  ;;  %v4155_v43 = vcombine.low %v129_v33, %v133_v34 }
 0x185   :  { %2692 = vmatprep.subr.bf16.mxu1 %v4408_v53  ;;  %v4480_v53 = vcombine.high %v455_v49, %v459_v50 }
 0x186   :  { %2844 = vmatpush1.bf16.msra.mxu0 %v4521_v54  ;;  %v4788_v54 = vld [vmem:[#allocation8 + $0x80] ss:$8 sps:$4 sm:$0xff]  }
 0x187   :  { %3773 = vmatprep.subr.bf16.mxu0 %v4766_v57  ;;  %v4793_v57 = vld [vmem:[#allocation8 + $0x94] ss:$8 sps:$4 sm:$0xff]  }
 0x188   :  { %2693 = vmatpush1.bf16.msra.mxu1 %v4407_v58  ;;  %v4479_v58 = vcombine.low %v455_v49, %v459_v50  ;;  %v153_v50 = vld [vmem:[#allocation5 + $0x118] sm:$0xff] }
 0x189   :  { %2846 = vmatmul.mubr.bf16.vlgmr.msra.gmra.mrb[4].mxu0 %v5324_v27  ;;  %2694 = vmatprep.subr.bf16.mxu1 %v4416_v59  ;;  %v4488_v59 = vcombine.high %v463_v55, %v467_v56 }
 0x18a   :  { %3774 = vmatpush1.bf16.msra.mxu0 %v4764_v60  ;;  %v4791_v60 = vld [vmem:[#allocation8 + $0x90] ss:$8 sps:$4 sm:$0xff]  }
 0x18b   :  { %3775 = vmatprep.subr.bf16.mxu0 %v4769_v63  ;;  %v4796_v63 = vld [vmem:[#allocation8 + $0xa4] ss:$8 sps:$4 sm:$0xff]  }
 0x18c   :  { %2695 = vmatpush1.bf16.msra.mxu1 %v4415_v1  ;;  %v4487_v1 = vcombine.low %v463_v55, %v467_v56  ;;  %v161_v55 = vld [vmem:[#allocation5 + $0x158] sm:$0xff] }
 0x18d   :  { %2696 = vmatprep.subr.bf16.mxu1 %v4424_v3  ;;  %v4496_v3 = vcombine.high %v471_v61, %v475_v62 }
 0x18e   :  { %3776 = vmatpush1.bf16.msra.mxu0 %v4767_v4  ;;  %v4794_v4 = vld [vmem:[#allocation8 + $0xa0] ss:$8 sps:$4 sm:$0xff]  }
 0x18f   :  { %3777 = vmatprep.subr.bf16.mxu0 %v4772_v7  ;;  %v4799_v7 = vld [vmem:[#allocation8 + $0xb4] ss:$8 sps:$4 sm:$0xff]  }
 0x190   :  { %2697 = vmatpush1.bf16.msra.mxu1 %v4423_v8  ;;  %v4495_v8 = vcombine.low %v471_v61, %v475_v62  ;;  %v169_v61 = vld [vmem:[#allocation5 + $0x198] sm:$0xff] }
 0x191   :  { %2698 = vmatprep.subr.bf16.mxu1 %v4432_v10  ;;  %v4504_v10 = vcombine.high %v479_v5, %v483_v6  ;;  %v173_v62 = vld [vmem:[#allocation5 + $0x1b8] sm:$0xff] }
 0x192   :  { %3778 = vmatpush1.bf16.msra.mxu0 %v4770_v11  ;;  %v4797_v11 = vld [vmem:[#allocation8 + $0xb0] ss:$8 sps:$4 sm:$0xff]  }
 0x193   :  { %3779 = vmatprep.subr.bf16.mxu0 %v4775_v14  ;;  %v4802_v14 = vld [vmem:[#allocation8 + $0xc4] ss:$8 sps:$4 sm:$0xff]  }
 0x194   :  { %2699 = vmatpush1.bf16.msra.mxu1 %v4431_v16  ;;  %v4503_v16 = vcombine.low %v479_v5, %v483_v6  ;;  %v177_v6 = vld [vmem:[#allocation5 + $0x1d8] sm:$0xff] }
 0x195   :  { %2700 = vmatprep.subr.bf16.mxu1 %v4440_v17  ;;  %v4512_v17 = vcombine.high %v487_v12, %v491_v13 }
 0x196   :  { %3780 = vmatpush1.bf16.msra.mxu0 %v4773_v18  ;;  %v4800_v18 = vld [vmem:[#allocation8 + $0xc0] ss:$8 sps:$4 sm:$0xff]  }
 0x197   :  { %3781 = vmatprep.subr.bf16.mxu0 %v4778_v22  ;;  %v4805_v22 = vld [vmem:[#allocation8 + $0xd4] ss:$8 sps:$4 sm:$0xff]  }
 0x198   :  { %2701 = vmatpush1.bf16.msra.mxu1 %v4439_v23  ;;  %v4511_v23 = vcombine.low %v487_v12, %v491_v13  ;;  %v4195_v13 = vcombine.low %v169_v61, %v173_v62 }
 0x199   :  { %2702 = vmatprep.subr.bf16.mxu1 %v4448_v24  ;;  %v4520_v24 = vcombine.high %v495_v20, %v499_v21 }
 0x19a   :  { %3782 = vmatpush1.bf16.msra.mxu0 %v4776_v39  ;;  %v4803_v39 = vld [vmem:[#allocation8 + $0xd0] ss:$8 sps:$4 sm:$0xff]  }
 0x19b   :  { %3783 = vmatprep.subr.bf16.mxu0 %v4781_v28  ;;  %v4808_v28 = vld [vmem:[#allocation8 + $0xe4] ss:$8 sps:$4 sm:$0xff]  }
 0x19c   :  { %v5344_v36 = vpop.f32.mrb[0].mxu0  ;;  %2703 = vmatpush1.bf16.msra.mxu1 %v4447_v30  ;;  %v4519_v30 = vcombine.low %v495_v20, %v499_v21  ;;  %v185_v20 = vld [vmem:[#allocation5 + $0x218] sm:$0xff] }
 0x19d   :  { %v5346_v37 = vpop.f32.mrb[1].mxu0  ;;  %2704 = vmatprep.subr.bf16.mxu1 %v4456_v31  ;;  %v4148_v31 = vcombine.high %v121_v25, %v125_v26  ;;  %v189_v21 = vld [vmem:[#allocation5 + $0x238] sm:$0xff] }
 0x19e   :  { %3784 = vmatpush1.bf16.msra.mxu0 %v4779_v32  ;;  %v2605_v9 = vpop.f32.mrb[2].mxu0  ;;  %v4806_v32 = vld [vmem:[#allocation8 + $0xe0] ss:$8 sps:$4 sm:$0xff]  }
 0x19f   :  { %3785 = vmatprep.subr.bf16.mxu0 %v4784_v35  ;;  %v2606_v45 = vpop.f32.mrb[3].mxu0  ;;  %v4811_v35 = vld [vmem:[#allocation8 + $0xf4] ss:$8 sps:$4 sm:$0xff]  }
 0x1a0   :  { %2705 = vmatpush1.bf16.msra.mxu1 %v4455_v0  ;;  %v4147_v0 = vcombine.low %v121_v25, %v125_v26  ;;  %v137_v9 = vld [vmem:[#allocation5 + $0x98] sm:$0xff]  ;;  %v4212_v25 = vcombine.high %v185_v20, %v189_v21 }
 0x1a1   :  { %2706 = vmatprep.subr.bf16.mxu1 %v4464_v38  ;;  %v4156_v38 = vcombine.high %v129_v33, %v133_v34  ;;  %v145_v45 = vld [vmem:[#allocation5 + $0xd8] sm:$0xff] }
 0x1a2   :  { %3786 = vmatpush1.bf16.msra.mxu0 %v4782_v40  ;;  %v4809_v40 = vld [vmem:[#allocation8 + $0xf0] ss:$8 sps:$4 sm:$0xff]   ;;  %v4817_v33 = vld [vmem:[#allocation8 + $0x114] ss:$8 sps:$4 sm:$0xff]  }
 0x1a3   :  { %3787 = vmatprep.subr.bf16.mxu0 %v4787_v44  ;;  %v4164_v44 = vcombine.high %v137_v9, %v141_v41  ;;  %v201_v34 = vld [vmem:[#allocation5 + $0x298] sm:$0xff] }
 0x1a4   :  { %2707 = vmatpush1.bf16.msra.mxu1 %v4463_v46  ;;  %v149_v46 = vld [vmem:[#allocation5 + $0xf8] sm:$0xff] }
 0x1a5   :  { %2708 = vmatprep.subr.bf16.mxu1 %v4472_v47  ;;  %v504_v47 = vlaneseq  ;;  %v4172_v49 = vcombine.high %v145_v45, %v149_v46 }
 0x1a6   :  { %3788 = vmatpush1.bf16.msra.mxu0 %v4785_v48  ;;  %v4163_v48 = vcombine.low %v137_v9, %v141_v41  ;;  %v209_v41 = vld [vmem:[#allocation5 + $0x2d8] sm:$0xff] }
 0x1a7   :  { %3789 = vmatprep.subr.bf16.mxu0 %v4790_v51  ;;  %v157_v51 = vld [vmem:[#allocation5 + $0x138] sm:$0xff] }
 0x1a8   :  { %2709 = vmatpush1.bf16.msra.mxu1 %v4471_v52  ;;  %v5350_v52 = vshrl.u32 %v504_v47, 7 }
 0x1a9   :  { %2710 = vmatprep.subr.bf16.mxu1 %v4480_v53  ;;  %v4171_v53 = vcombine.low %v145_v45, %v149_v46  ;;  %v4823_v46 = vld [vmem:[#allocation8 + $0x134] ss:$8 sps:$4 sm:$0xff]  }
 0x1aa   :  { %3790 = vmatpush1.bf16.msra.mxu0 %v4788_v54  ;;  %v4180_v54 = vcombine.high %v153_v50, %v157_v51  ;;  %v506_v56 = vsub.s32 0, %v5350_v52 }
 0x1ab   :  { %3791 = vmatprep.subr.bf16.mxu0 %v4793_v57  ;;  %v4179_v57 = vcombine.low %v153_v50, %v157_v51  ;;  %v4821_v50 = vld [vmem:[#allocation8 + $0x130] ss:$8 sps:$4 sm:$0xff]  }
 0x1ac   :  { %2711 = vmatpush1.bf16.msra.mxu1 %v4479_v58  ;;  %v5353_v58 = vld [vmem:[#allocation7] sm:$0xff] }
 0x1ad   :  { %2712 = vmatprep.subr.bf16.mxu1 %v4488_v59  ;;  %v510_v59 = vsub.s32 1, %v5350_v52 }
 0x1ae   :  { %3792 = vmatpush1.bf16.msra.mxu0 %v4791_v60 }
 0x1af   :  { %3793 = vmatprep.subr.bf16.mxu0 %v4796_v63  ;;  %v507_v63 = vrot.slane %v5353_v58, %v506_v56 }
 0x1b0   :  { %2713 = vmatpush1.bf16.msra.mxu1 %v4487_v1  ;;  %v511_v1 = vrot.slane %v5353_v58, %v510_v59 }
 0x1b1   :  { %2714 = vmatprep.subr.bf16.mxu1 %v4496_v3 }
 0x1b2   :  { %3794 = vmatpush1.bf16.msra.mxu0 %v4794_v4  ;;  %v4196_v4 = vcombine.high %v169_v61, %v173_v62  ;;  %v4829_v61 = vld [vmem:[#allocation8 + $0x154] ss:$8 sps:$4 sm:$0xff]  }
 0x1b3   :  { %3795 = vmatprep.subr.bf16.mxu0 %v4799_v7  ;;  %v181_v7 = vld [vmem:[#allocation5 + $0x1f8] sm:$0xff] }
 0x1b4   :  { %2715 = vmatpush1.bf16.msra.mxu1 %v4495_v8 }
 0x1b5   :  { %2716 = vmatprep.subr.bf16.mxu1 %v4504_v10 }
 0x1b6   :  { %3796 = vmatpush1.bf16.msra.mxu0 %v4797_v11 }
 0x1b7   :  { %3797 = vmatprep.subr.bf16.mxu0 %v4802_v14 }
 0x1b8   :  { %2717 = vmatpush1.bf16.msra.mxu1 %v4503_v16 }
 0x1b9   :  { %2718 = vmatprep.subr.bf16.mxu1 %v4512_v17  ;;  %v4204_v17 = vcombine.high %v177_v6, %v181_v7 }
 0x1ba   :  { %3798 = vmatpush1.bf16.msra.mxu0 %v4800_v18 }
 0x1bb   :  { %3799 = vmatprep.subr.bf16.mxu0 %v4805_v22 }
 0x1bc   :  { %2719 = vmatpush1.bf16.msra.mxu1 %v4511_v23 }
 0x1bd   :  { %2720 = vmatprep.subr.bf16.mxu1 %v4520_v24  ;;  %v4203_v24 = vcombine.low %v177_v6, %v181_v7  ;;  %v241_v7 = vld [vmem:[#allocation5 + $0x3d8] sm:$0xff] }
 0x1be   :  { %3800 = vmatpush1.bf16.msra.mxu0 %v4803_v39  ;;  %v4814_v39 = vld [vmem:[#allocation8 + $0x104] ss:$8 sps:$4 sm:$0xff]  }
 0x1bf   :  { %3801 = vmatprep.subr.bf16.mxu0 %v4808_v28  ;;  %v193_v28 = vld [vmem:[#allocation5 + $0x258] sm:$0xff] }
 0x1c0   :  { %2721 = vmatpush1.bf16.msra.mxu1 %v4519_v30  ;;  %v197_v30 = vld [vmem:[#allocation5 + $0x278] sm:$0xff] }
 0x1c1   :  { %2854 = vmatprep.subr.bf16.mxu1 %v4148_v31  ;;  %v4812_v31 = vld [vmem:[#allocation8 + $0x100] ss:$8 sps:$4 sm:$0xff]  }
 0x1c2   :  { %3802 = vmatpush1.bf16.msra.mxu0 %v4806_v32  ;;  %v4211_v32 = vcombine.low %v185_v20, %v189_v21  ;;  %v4838_v20 = vld [vmem:[#allocation8 + $0x184] ss:$8 sps:$4 sm:$0xff]  }
 0x1c3   :  { %3803 = vmatprep.subr.bf16.mxu0 %v4811_v35  ;;  %2723 = vmatmul.mubr.bf16.vlgmr.msra.gmra.mrb[4].mxu1 %v5324_v27  ;;  %v205_v35 = vld [vmem:[#allocation5 + $0x2b8] sm:$0xff] }
 0x1c4   :  { %2855 = vmatpush1.bf16.msra.mxu1 %v4147_v0  ;;  %2886 = vmatprep.mubr.bf16.mxu1 %v5301_v42  ;;  %v165_v42 = vld [vmem:[#allocation5 + $0x178] sm:$0xff]  ;;  %v4228_v9 = vcombine.high %v201_v34, %v205_v35  ;;  %v4227_v45 = vcombine.low %v201_v34, %v205_v35  ;;  %v4842_v35 = vld [vmem:[#allocation8 + $0x1a0] ss:$8 sps:$4 sm:$0xff]  }
 0x1c5   :  { %2856 = vmatprep.subr.bf16.mxu1 %v4156_v38  ;;  %v4188_v60 = vcombine.high %v161_v55, %v165_v42  ;;  %v4187_v3 = vcombine.low %v161_v55, %v165_v42  ;;  %v4815_v0 = vld [vmem:[#allocation8 + $0x110] ss:$8 sps:$4 sm:$0xff]   ;;  %v4219_v38 = vcombine.low %v193_v28, %v197_v30 }
 0x1c6   :  { %3804 = vmatpush1.bf16.msra.mxu0 %v4809_v40  ;;  %v4820_v40 = vld [vmem:[#allocation8 + $0x124] ss:$8 sps:$4 sm:$0xff]   ;;  %v225_v55 = vld [vmem:[#allocation5 + $0x358] sm:$0xff] }
 0x1c7   :  { %3814 = vmatprep.subr.bf16.mxu0 %v4814_v39  ;;  %v229_v42 = vld [vmem:[#allocation5 + $0x378] sm:$0xff] }
 0x1c8   :  { %2857 = vmatpush1.bf16.msra.mxu1 %v4155_v43  ;;  %v213_v43 = vld [vmem:[#allocation5 + $0x2f8] sm:$0xff]  ;;  %v4252_v62 = vcombine.high %v225_v55, %v229_v42 }
 0x1c9   :  { %2858 = vmatprep.subr.bf16.mxu1 %v4164_v44  ;;  %v4818_v44 = vld [vmem:[#allocation8 + $0x120] ss:$8 sps:$4 sm:$0xff]   ;;  %v4236_v47 = vcombine.high %v209_v41, %v213_v43  ;;  %v4235_v51 = vcombine.low %v209_v41, %v213_v43  ;;  %v277_v34 = vld [vmem:[#allocation5 + $0x4f8] sm:$0xff]  ;;  %v4850_v43 = vld [vmem:[#allocation8 + $0x1c4] ss:$8 sps:$4 sm:$0xff]  }
 0x1ca   :  { %v4845_v41 = vld [vmem:[#allocation8 + $0x1b0] ss:$8 sps:$4 sm:$0xff]  }
 0x1cc   :  { %2859 = vmatpush1.bf16.msra.mxu1 %v4163_v48  ;;  %v217_v48 = vld [vmem:[#allocation5 + $0x318] sm:$0xff] }
 0x1cd   :  { %2860 = vmatprep.subr.bf16.mxu1 %v4172_v49  ;;  %v221_v49 = vld [vmem:[#allocation5 + $0x338] sm:$0xff] }
 0x1d0   :  { %2861 = vmatpush1.bf16.msra.mxu1 %v4171_v53  ;;  %v4826_v53 = vld [vmem:[#allocation8 + $0x144] ss:$8 sps:$4 sm:$0xff]  }
 0x1d1   :  { %2862 = vmatprep.subr.bf16.mxu1 %v4180_v54  ;;  %v4244_v54 = vcombine.high %v217_v48, %v221_v49 }
 0x1d4   :  { %2863 = vmatpush1.bf16.msra.mxu1 %v4179_v57  ;;  %v4824_v57 = vld [vmem:[#allocation8 + $0x140] ss:$8 sps:$4 sm:$0xff]  }
 0x1d5   :  { %2864 = vmatprep.subr.bf16.mxu1 %v4188_v60  ;;  %v4243_v60 = vcombine.low %v217_v48, %v221_v49  ;;  %v4853_v48 = vld [vmem:[#allocation8 + $0x1d4] ss:$8 sps:$4 sm:$0xff]  }
 0x1d6   :  { %v2560_v5 = vpop.f32.mrb[0].mxu1 }
 0x1d7   :  { %v4692_v8 = vadd.f32 %v2560_v5, %v507_v63  ;;  %v2562_v10 = vpop.f32.mrb[1].mxu1  ;;  %v233_v63 = vld [vmem:[#allocation5 + $0x398] sm:$0xff]  ;;  %v4832_v5 = vld [vmem:[#allocation8 + $0x164] ss:$8 sps:$4 sm:$0xff]  }
 0x1d8   :  { %v4694_v11 = vadd.f32 %v2562_v10, %v511_v1  ;;  %v2564_v12 = vpop.f32.mrb[2].mxu1  ;;  %2865 = vmatpush1.bf16.msra.mxu1 %v4187_v3  ;;  %v237_v1 = vld [vmem:[#allocation5 + $0x3b8] sm:$0xff]  ;;  %v4830_v10 = vld [vmem:[#allocation8 + $0x160] ss:$8 sps:$4 sm:$0xff]  }
 0x1d9   :  { %v4693_v14 = vadd.f32 %v4692_v8, %v5344_v36  ;;  %v2565_v16 = vpop.f32.mrb[3].mxu1  ;;  %2866 = vmatprep.subr.bf16.mxu1 %v4196_v4  ;;  %v4827_v3 = vld [vmem:[#allocation8 + $0x150] ss:$8 sps:$4 sm:$0xff]   ;;  %v4251_v4 = vcombine.low %v225_v55, %v229_v42  ;;  %v4260_v6 = vcombine.high %v233_v63, %v237_v1  ;;  %v4835_v12 = vld [vmem:[#allocation8 + $0x174] ss:$8 sps:$4 sm:$0xff]  }
 0x1da   :  { %v4695_v18 = vadd.f32 %v4694_v11, %v5346_v37  ;;  %v4220_v37 = vcombine.high %v193_v28, %v197_v30  ;;  %v245_v8 = vld [vmem:[#allocation5 + $0x3f8] sm:$0xff]  ;;  %v4259_v11 = vcombine.low %v233_v63, %v237_v1  ;;  %v4856_v42 = vld [vmem:[#allocation8 + $0x1e4] ss:$8 sps:$4 sm:$0xff]  }
 0x1db   :  { %v2977_v22 = vmax.f32 %v4693_v14, 0.0  ;;  %v249_v14 = vld [vmem:[#allocation5 + $0x418] sm:$0xff] }
 0x1dc   :  { %v2978_v23 = vmax.f32 %v4695_v18, 0.0  ;;  %2867 = vmatpush1.bf16.msra.mxu1 %v4195_v13  ;;  %v4268_v13 = vcombine.high %v241_v7, %v245_v8  ;;  %v253_v16 = vld [vmem:[#allocation5 + $0x438] sm:$0xff]  ;;  %v4267_v18 = vcombine.low %v241_v7, %v245_v8  ;;  %v4862_v8 = vld [vmem:[#allocation8 + $0x204] ss:$8 sps:$4 sm:$0xff]  }
 0x1dd   :  { %2868 = vmatprep.subr.bf16.mxu1 %v4204_v17  ;;  %v2985_v36 = vpack.c.bf16 %v2977_v22, %v2977_v22  ;;  %v4833_v17 = vld [vmem:[#allocation8 + $0x170] ss:$8 sps:$4 sm:$0xff]   ;;  %v4276_v21 = vcombine.high %v249_v14, %v253_v16  ;;  %v4275_v39 = vcombine.low %v249_v14, %v253_v16  ;;  %v4859_v1 = vld [vmem:[#allocation8 + $0x1f4] ss:$8 sps:$4 sm:$0xff]  }
 0x1de   :  { %v2986_v26 = vpack.c.bf16 %v2978_v23, %v2978_v23  ;;  %v257_v22 = vld [vmem:[#allocation5 + $0x458] sm:$0xff] }
 0x1df   :  { %v261_v23 = vld [vmem:[#allocation5 + $0x478] sm:$0xff] }
 0x1e0   :  { %2869 = vmatpush1.bf16.msra.mxu1 %v4203_v24  ;;  %3805 = vmatprep.mubr.bf16.mxu0 %v2986_v26  ;;  %v4836_v24 = vld [vmem:[#allocation8 + $0x180] ss:$8 sps:$4 sm:$0xff]   ;;  %v4284_v26 = vcombine.high %v257_v22, %v261_v23  ;;  %v265_v28 = vld [vmem:[#allocation5 + $0x498] sm:$0xff] }
 0x1e1   :  { %3806 = vmatmul.mubr.bf16.vlgmr.msra.gmra.mrb[8].mxu0 %v2985_v36  ;;  %2870 = vmatprep.subr.bf16.mxu1 %v4212_v25  ;;  %v4841_v25 = vld [vmem:[#allocation8 + $0x194] ss:$8 sps:$4 sm:$0xff]   ;;  %v4844_v36 = vld [vmem:[#allocation8 + $0x1a4] ss:$8 sps:$4 sm:$0xff]  }
 0x1e2   :  { %3815 = vmatpush1.bf16.msra.mxu0 %v4812_v31  ;;  %v269_v30 = vld [vmem:[#allocation5 + $0x4b8] sm:$0xff] }
 0x1e3   :  { %3816 = vmatprep.subr.bf16.mxu0 %v4817_v33  ;;  %v4839_v31 = vld [vmem:[#allocation8 + $0x190] ss:$8 sps:$4 sm:$0xff]   ;;  %v4292_v33 = vcombine.high %v265_v28, %v269_v30 }
 0x1e4   :  { %2871 = vmatpush1.bf16.msra.mxu1 %v4211_v32  ;;  %v4283_v32 = vcombine.low %v257_v22, %v261_v23  ;;  %v329_v16 = vld [vmem:[#allocation5 + $0x698] sm:$0xff] }
 0x1e5   :  { %2872 = vmatprep.subr.bf16.mxu1 %v4220_v37  ;;  %v273_v37 = vld [vmem:[#allocation5 + $0x4d8] sm:$0xff] }
 0x1e6   :  { %3817 = vmatpush1.bf16.msra.mxu0 %v4815_v0  ;;  %v4847_v0 = vld [vmem:[#allocation8 + $0x1b4] ss:$8 sps:$4 sm:$0xff]  }
 0x1e7   :  { %3818 = vmatprep.subr.bf16.mxu0 %v4820_v40  ;;  %v4300_v40 = vcombine.high %v273_v37, %v277_v34  ;;  %v341_v22 = vld [vmem:[#allocation5 + $0x6f8] sm:$0xff] }
 0x1e8   :  { %2873 = vmatpush1.bf16.msra.mxu1 %v4219_v38  ;;  %v4291_v38 = vcombine.low %v265_v28, %v269_v30  ;;  %v353_v30 = vld [vmem:[#allocation5 + $0x758] sm:$0xff] }
 0x1e9   :  { %2874 = vmatprep.subr.bf16.mxu1 %v4228_v9  ;;  %v281_v9 = vld [vmem:[#allocation5 + $0x518] sm:$0xff] }
 0x1ea   :  { %3819 = vmatpush1.bf16.msra.mxu0 %v4818_v44 }
 0x1eb   :  { %3820 = vmatprep.subr.bf16.mxu0 %v4823_v46  ;;  %v293_v46 = vld [vmem:[#allocation5 + $0x578] sm:$0xff] }
 0x1ec   :  { %2875 = vmatpush1.bf16.msra.mxu1 %v4227_v45  ;;  %v289_v45 = vld [vmem:[#allocation5 + $0x558] sm:$0xff] }
 0x1ed   :  { %2876 = vmatprep.subr.bf16.mxu1 %v4236_v47  ;;  %v4848_v47 = vld [vmem:[#allocation8 + $0x1c0] ss:$8 sps:$4 sm:$0xff]   ;;  %v4315_v55 = vcombine.low %v289_v45, %v293_v46 }
 0x1ee   :  { %3821 = vmatpush1.bf16.msra.mxu0 %v4821_v50  ;;  %v4316_v50 = vcombine.high %v289_v45, %v293_v46  ;;  %v389_v45 = vld [vmem:[#allocation5 + $0x878] sm:$0xff] }
 0x1ef   :  { %3822 = vmatprep.subr.bf16.mxu0 %v4826_v53  ;;  %v301_v53 = vld [vmem:[#allocation5 + $0x5b8] sm:$0xff] }
 0x1f0   :  { %2877 = vmatpush1.bf16.msra.mxu1 %v4235_v51  ;;  %v297_v51 = vld [vmem:[#allocation5 + $0x598] sm:$0xff] }
 0x1f1   :  { %2878 = vmatprep.subr.bf16.mxu1 %v4244_v54  ;;  %v4851_v54 = vld [vmem:[#allocation8 + $0x1d0] ss:$8 sps:$4 sm:$0xff]   ;;  %v4323_v63 = vcombine.low %v297_v51, %v301_v53 }
 0x1f2   :  { %3823 = vmatpush1.bf16.msra.mxu0 %v4824_v57  ;;  %v4324_v57 = vcombine.high %v297_v51, %v301_v53  ;;  %v401_v53 = vld [vmem:[#allocation5 + $0x8d8] sm:$0xff] }
 0x1f3   :  { %3824 = vmatprep.subr.bf16.mxu0 %v4829_v61  ;;  %v309_v61 = vld [vmem:[#allocation5 + $0x5f8] sm:$0xff] }
 0x1f4   :  { %2879 = vmatpush1.bf16.msra.mxu1 %v4243_v60  ;;  %v305_v60 = vld [vmem:[#allocation5 + $0x5d8] sm:$0xff] }
 0x1f5   :  { %2880 = vmatprep.subr.bf16.mxu1 %v4252_v62  ;;  %v4854_v62 = vld [vmem:[#allocation8 + $0x1e0] ss:$8 sps:$4 sm:$0xff]   ;;  %v4331_v7 = vcombine.low %v305_v60, %v309_v61 }
 0x1f6   :  { %3825 = vmatpush1.bf16.msra.mxu0 %v4827_v3  ;;  %v4332_v3 = vcombine.high %v305_v60, %v309_v61  ;;  %v413_v60 = vld [vmem:[#allocation5 + $0x938] sm:$0xff] }
 0x1f7   :  { %3826 = vmatprep.subr.bf16.mxu0 %v4832_v5  ;;  %v317_v5 = vld [vmem:[#allocation5 + $0x638] sm:$0xff] }
 0x1f8   :  { %2881 = vmatpush1.bf16.msra.mxu1 %v4251_v4  ;;  %v313_v4 = vld [vmem:[#allocation5 + $0x618] sm:$0xff] }
 0x1f9   :  { %2882 = vmatprep.subr.bf16.mxu1 %v4260_v6  ;;  %v4857_v6 = vld [vmem:[#allocation8 + $0x1f0] ss:$8 sps:$4 sm:$0xff]  }
 0x1fa   :  { %3827 = vmatpush1.bf16.msra.mxu0 %v4830_v10  ;;  %v4340_v10 = vcombine.high %v313_v4, %v317_v5 }
 0x1fb   :  { %3828 = vmatprep.subr.bf16.mxu0 %v4835_v12  ;;  %v325_v12 = vld [vmem:[#allocation5 + $0x678] sm:$0xff] }
 0x1fc   :  { %2883 = vmatpush1.bf16.msra.mxu1 %v4259_v11  ;;  %v321_v11 = vld [vmem:[#allocation5 + $0x658] sm:$0xff] }
 0x1fd   :  { %2884 = vmatprep.subr.bf16.mxu1 %v4268_v13  ;;  %v4339_v13 = vcombine.low %v313_v4, %v317_v5  ;;  %v4348_v14 = vcombine.high %v321_v11, %v325_v12  ;;  %v429_v4 = vld [vmem:[#allocation5 + $0x9b8] sm:$0xff] }
 0x1fe   :  { %3829 = vmatpush1.bf16.msra.mxu0 %v4833_v17  ;;  %v333_v17 = vld [vmem:[#allocation5 + $0x6b8] sm:$0xff] }
 0x1ff   :  { %3830 = vmatprep.subr.bf16.mxu0 %v4838_v20  ;;  %v4356_v20 = vcombine.high %v329_v16, %v333_v17  ;;  %v4355_v23 = vcombine.low %v329_v16, %v333_v17 }
 0x200   :  { %2885 = vmatpush1.bf16.msra.mxu1 %v4267_v18  ;;  %v4347_v18 = vcombine.low %v321_v11, %v325_v12  ;;  %v441_v12 = vld [vmem:[#allocation5 + $0xa18] sm:$0xff] }
 0x201   :  { %2895 = vmatprep.subr.bf16.mxu1 %v4276_v21  ;;  %v337_v21 = vld [vmem:[#allocation5 + $0x6d8] sm:$0xff] }
 0x202   :  { %3831 = vmatpush1.bf16.msra.mxu0 %v4836_v24  ;;  %v4364_v24 = vcombine.high %v337_v21, %v341_v22 }
 0x203   :  { %2887 = vmatmul.mubr.bf16.vlgmr.msra.gmra.mrb[8].mxu1 %v5315_v15  ;;  %3832 = vmatprep.subr.bf16.mxu0 %v4841_v25  ;;  %v285_v15 = vld [vmem:[#allocation5 + $0x538] sm:$0xff] }
 0x204   :  { %2896 = vmatpush1.bf16.msra.mxu1 %v4275_v39  ;;  %2927 = vmatprep.mubr.bf16.mxu1 %v5319_v19  ;;  %v4299_v19 = vcombine.low %v273_v37, %v277_v34  ;;  %v4308_v44 = vcombine.high %v281_v9, %v285_v15  ;;  %v4307_v49 = vcombine.low %v281_v9, %v285_v15  ;;  %v345_v39 = vld [vmem:[#allocation5 + $0x718] sm:$0xff] }
 0x205   :  { %2897 = vmatprep.subr.bf16.mxu1 %v4284_v26  ;;  %v349_v25 = vld [vmem:[#allocation5 + $0x738] sm:$0xff]  ;;  %v4363_v26 = vcombine.low %v337_v21, %v341_v22 }
 0x206   :  { %3833 = vmatpush1.bf16.msra.mxu0 %v4839_v31  ;;  %v4372_v28 = vcombine.high %v345_v39, %v349_v25  ;;  %v357_v31 = vld [vmem:[#allocation5 + $0x778] sm:$0xff] }
 0x207   :  { %3834 = vmatprep.subr.bf16.mxu0 %v4844_v36  ;;  %v4371_v36 = vcombine.low %v345_v39, %v349_v25  ;;  %v365_v37 = vld [vmem:[#allocation5 + $0x7b8] sm:$0xff]  ;;  %v4379_v34 = vcombine.low %v353_v30, %v357_v31 }
 0x208   :  { %2898 = vmatpush1.bf16.msra.mxu1 %v4283_v32  ;;  %v4380_v32 = vcombine.high %v353_v30, %v357_v31  ;;  %v377_v15 = vld [vmem:[#allocation5 + $0x818] sm:$0xff] }
 0x209   :  { %2899 = vmatprep.subr.bf16.mxu1 %v4292_v33  ;;  %v361_v33 = vld [vmem:[#allocation5 + $0x798] sm:$0xff] }
 0x20a   :  { %3835 = vmatpush1.bf16.msra.mxu0 %v4842_v35  ;;  %v4388_v35 = vcombine.high %v361_v33, %v365_v37  ;;  %v449_v21 = vld [vmem:[#allocation5 + $0xa58] sm:$0xff] }
 0x20b   :  { %3836 = vmatprep.subr.bf16.mxu0 %v4847_v0  ;;  %v369_v0 = vld [vmem:[#allocation5 + $0x7d8] sm:$0xff] }
 0x20c   :  { %2900 = vmatpush1.bf16.msra.mxu1 %v4291_v38  ;;  %v373_v38 = vld [vmem:[#allocation5 + $0x7f8] sm:$0xff] }
 0x20d   :  { %2901 = vmatprep.subr.bf16.mxu1 %v4300_v40  ;;  %v4387_v40 = vcombine.low %v361_v33, %v365_v37  ;;  %v4396_v9 = vcombine.high %v369_v0, %v373_v38  ;;  %v453_v22 = vld [vmem:[#allocation5 + $0xa78] sm:$0xff] }
 0x20e   :  { %3837 = vmatpush1.bf16.msra.mxu0 %v4845_v41  ;;  %v381_v41 = vld [vmem:[#allocation5 + $0x838] sm:$0xff]  ;;  %v4476_v39 = vcombine.high %v449_v21, %v453_v22 }
 0x20f   :  { %3838 = vmatprep.subr.bf16.mxu0 %v4850_v43  ;;  %v4395_v43 = vcombine.low %v369_v0, %v373_v38  ;;  %v4403_v46 = vcombine.low %v377_v15, %v381_v41  ;;  %v457_v25 = vld [vmem:[#allocation5 + $0xa98] sm:$0xff] }
 0x210   :  { %2902 = vmatpush1.bf16.msra.mxu1 %v4299_v19  ;;  %v4404_v19 = vcombine.high %v377_v15, %v381_v41  ;;  %v465_v31 = vld [vmem:[#allocation5 + $0xad8] sm:$0xff] }
 0x211   :  { %2903 = vmatprep.subr.bf16.mxu1 %v4308_v44  ;;  %v385_v44 = vld [vmem:[#allocation5 + $0x858] sm:$0xff] }
 0x212   :  { %3839 = vmatpush1.bf16.msra.mxu0 %v4848_v47  ;;  %v4412_v47 = vcombine.high %v385_v44, %v389_v45  ;;  %v473_v37 = vld [vmem:[#allocation5 + $0xb18] sm:$0xff] }
 0x213   :  { %3840 = vmatprep.subr.bf16.mxu0 %v4853_v48  ;;  %v393_v48 = vld [vmem:[#allocation5 + $0x898] sm:$0xff] }
 0x214   :  { %2904 = vmatpush1.bf16.msra.mxu1 %v4307_v49  ;;  %v397_v49 = vld [vmem:[#allocation5 + $0x8b8] sm:$0xff] }
 0x215   :  { %2905 = vmatprep.subr.bf16.mxu1 %v4316_v50  ;;  %v4411_v50 = vcombine.low %v385_v44, %v389_v45  ;;  %v4420_v51 = vcombine.high %v393_v48, %v397_v49  ;;  %v481_v38 = vld [vmem:[#allocation5 + $0xb58] sm:$0xff] }
 0x216   :  { %3841 = vmatpush1.bf16.msra.mxu0 %v4851_v54  ;;  %v405_v54 = vld [vmem:[#allocation5 + $0x8f8] sm:$0xff] }
 0x217   :  { %3842 = vmatprep.subr.bf16.mxu0 %v4856_v42  ;;  %v4428_v42 = vcombine.high %v401_v53, %v405_v54  ;;  %v4427_v61 = vcombine.low %v401_v53, %v405_v54  ;;  %v489_v41 = vld [vmem:[#allocation5 + $0xb98] sm:$0xff]  ;;  %v518_v54 = vsub.s32 3, %v5350_v52 }
 0x218   :  { %2906 = vmatpush1.bf16.msra.mxu1 %v4315_v55  ;;  %v4419_v55 = vcombine.low %v393_v48, %v397_v49  ;;  %v497_v45 = vld [vmem:[#allocation5 + $0xbd8] sm:$0xff] }
 0x219   :  { %2907 = vmatprep.subr.bf16.mxu1 %v4324_v57  ;;  %v409_v57 = vld [vmem:[#allocation5 + $0x918] sm:$0xff] }
 0x21a   :  { %3843 = vmatpush1.bf16.msra.mxu0 %v4854_v62  ;;  %v4436_v62 = vcombine.high %v409_v57, %v413_v60 }
 0x21b   :  { %3844 = vmatprep.subr.bf16.mxu0 %v4859_v1  ;;  %v4435_v1 = vcombine.low %v409_v57, %v413_v60  ;;  %v519_v57 = vrot.slane %v5353_v58, %v518_v54  ;;  %v4960_v54 = vld [vmem:[#allocation11 + $0x50] sm:$0xff]  }
 0x21c   :  { %2908 = vmatpush1.bf16.msra.mxu1 %v4323_v63  ;;  %v417_v63 = vld [vmem:[#allocation5 + $0x958] sm:$0xff] }
 0x21d   :  { %2909 = vmatprep.subr.bf16.mxu1 %v4332_v3  ;;  %v425_v3 = vld [vmem:[#allocation5 + $0x998] sm:$0xff] }
 0x21e   :  { %3845 = vmatpush1.bf16.msra.mxu0 %v4857_v6  ;;  %v4452_v6 = vcombine.high %v425_v3, %v429_v4 }
 0x21f   :  { %3855 = vmatprep.subr.bf16.mxu0 %v4862_v8  ;;  %v437_v8 = vld [vmem:[#allocation5 + $0x9f8] sm:$0xff] }
 0x220   :  { %2910 = vmatpush1.bf16.msra.mxu1 %v4331_v7  ;;  %v433_v7 = vld [vmem:[#allocation5 + $0x9d8] sm:$0xff] }
 0x221   :  { %2911 = vmatprep.subr.bf16.mxu1 %v4340_v10  ;;  %v4451_v10 = vcombine.low %v425_v3, %v429_v4  ;;  %v4460_v11 = vcombine.high %v433_v7, %v437_v8  ;;  %v4459_v16 = vcombine.low %v433_v7, %v437_v8  ;;  %v4865_v8 = vld [vmem:[#allocation8 + $0x214] ss:$8 sps:$4 sm:$0xff]  }
 0x224   :  { %2912 = vmatpush1.bf16.msra.mxu1 %v4339_v13  ;;  %v445_v13 = vld [vmem:[#allocation5 + $0xa38] sm:$0xff] }
 0x225   :  { %2913 = vmatprep.subr.bf16.mxu1 %v4348_v14 }
 0x228   :  { %2914 = vmatpush1.bf16.msra.mxu1 %v4347_v18  ;;  %v4468_v18 = vcombine.high %v441_v12, %v445_v13 }
 0x229   :  { %2915 = vmatprep.subr.bf16.mxu1 %v4356_v20 }
 0x22c   :  { %2916 = vmatpush1.bf16.msra.mxu1 %v4355_v23 }
 0x22d   :  { %2917 = vmatprep.subr.bf16.mxu1 %v4364_v24  ;;  %v4467_v24 = vcombine.low %v441_v12, %v445_v13  ;;  %v4866_v12 = vld [vmem:[#allocation8 + $0x220] ss:$8 sps:$4 sm:$0xff]   ;;  %v4871_v13 = vld [vmem:[#allocation8 + $0x234] ss:$8 sps:$4 sm:$0xff]  }
 0x230   :  { %2918 = vmatpush1.bf16.msra.mxu1 %v4363_v26  ;;  %v461_v26 = vld [vmem:[#allocation5 + $0xab8] sm:$0xff] }
 0x231   :  { %2919 = vmatprep.subr.bf16.mxu1 %v4372_v28  ;;  %v4475_v28 = vcombine.low %v449_v21, %v453_v22  ;;  %v4484_v30 = vcombine.high %v457_v25, %v461_v26  ;;  %v4875_v21 = vld [vmem:[#allocation8 + $0x250] ss:$8 sps:$4 sm:$0xff]   ;;  %v4880_v22 = vld [vmem:[#allocation8 + $0x264] ss:$8 sps:$4 sm:$0xff]  }
 0x234   :  { %2920 = vmatpush1.bf16.msra.mxu1 %v4371_v36  ;;  %v469_v36 = vld [vmem:[#allocation5 + $0xaf8] sm:$0xff] }
 0x235   :  { %2921 = vmatprep.subr.bf16.mxu1 %v4380_v32  ;;  %v4483_v32 = vcombine.low %v457_v25, %v461_v26  ;;  %v4492_v33 = vcombine.high %v465_v31, %v469_v36  ;;  %v4886_v25 = vld [vmem:[#allocation8 + $0x284] ss:$8 sps:$4 sm:$0xff]   ;;  %v4884_v26 = vld [vmem:[#allocation8 + $0x280] ss:$8 sps:$4 sm:$0xff]  }
 0x238   :  { %2922 = vmatpush1.bf16.msra.mxu1 %v4379_v34  ;;  %v477_v34 = vld [vmem:[#allocation5 + $0xb38] sm:$0xff] }
 0x239   :  { %2923 = vmatprep.subr.bf16.mxu1 %v4388_v35  ;;  %v4491_v35 = vcombine.low %v465_v31, %v469_v36  ;;  %v4500_v0 = vcombine.high %v473_v37, %v477_v34  ;;  %v4892_v31 = vld [vmem:[#allocation8 + $0x2a4] ss:$8 sps:$4 sm:$0xff]   ;;  %v4890_v36 = vld [vmem:[#allocation8 + $0x2a0] ss:$8 sps:$4 sm:$0xff]  }
 0x23c   :  { %2924 = vmatpush1.bf16.msra.mxu1 %v4387_v40  ;;  %v485_v40 = vld [vmem:[#allocation5 + $0xb78] sm:$0xff] }
 0x23d   :  { %2925 = vmatprep.subr.bf16.mxu1 %v4396_v9  ;;  %v4499_v9 = vcombine.low %v473_v37, %v477_v34  ;;  %v4508_v15 = vcombine.high %v481_v38, %v485_v40  ;;  %v4898_v37 = vld [vmem:[#allocation8 + $0x2c4] ss:$8 sps:$4 sm:$0xff]   ;;  %v4896_v34 = vld [vmem:[#allocation8 + $0x2c0] ss:$8 sps:$4 sm:$0xff]  }
 0x240   :  { %2926 = vmatpush1.bf16.msra.mxu1 %v4395_v43  ;;  %v493_v43 = vld [vmem:[#allocation5 + $0xbb8] sm:$0xff] }
 0x241   :  { %2936 = vmatprep.subr.bf16.mxu1 %v4404_v19  ;;  %v4507_v19 = vcombine.low %v481_v38, %v485_v40  ;;  %v4516_v44 = vcombine.high %v489_v41, %v493_v43  ;;  %v4899_v38 = vld [vmem:[#allocation8 + $0x2d0] ss:$8 sps:$4 sm:$0xff]  }
 0x243   :  { %2928 = vmatmul.mubr.bf16.vlgmr.msra.gmra.mrb[8].mxu1 %v5331_v29  ;;  %v421_v29 = vld [vmem:[#allocation5 + $0x978] sm:$0xff] }
 0x244   :  { %2937 = vmatpush1.bf16.msra.mxu1 %v4403_v46  ;;  %2968 = vmatprep.mubr.bf16.mxu1 %v5308_v2  ;;  %v4444_v2 = vcombine.high %v417_v63, %v421_v29  ;;  %v4443_v5 = vcombine.low %v417_v63, %v421_v29  ;;  %v501_v46 = vld [vmem:[#allocation5 + $0xbf8] sm:$0xff] }
 0x245   :  { %2938 = vmatprep.subr.bf16.mxu1 %v4412_v47  ;;  %v4515_v47 = vcombine.low %v489_v41, %v493_v43  ;;  %v4524_v48 = vcombine.high %v497_v45, %v501_v46  ;;  %v4523_v49 = vcombine.low %v497_v45, %v501_v46  ;;  %v4907_v43 = vld [vmem:[#allocation8 + $0x2f4] ss:$8 sps:$4 sm:$0xff]   ;;  %v4910_v45 = vld [vmem:[#allocation8 + $0x304] ss:$8 sps:$4 sm:$0xff]   ;;  %v4908_v46 = vld [vmem:[#allocation8 + $0x300] ss:$8 sps:$4 sm:$0xff]  }
 0x248   :  { %2939 = vmatpush1.bf16.msra.mxu1 %v4411_v50  ;;  %v526_v50 = vsub.s32 5, %v5350_v52 }
 0x249   :  { %2940 = vmatprep.subr.bf16.mxu1 %v4420_v51  ;;  %v514_v51 = vsub.s32 2, %v5350_v52 }
 0x24a   :  { %v527_v53 = vrot.slane %v5353_v58, %v526_v50  ;;  %v4958_v50 = vld [vmem:[#allocation11 + $0x48] sm:$0xff]  }
 0x24c   :  { %2941 = vmatpush1.bf16.msra.mxu1 %v4419_v55  ;;  %v515_v55 = vrot.slane %v5353_v58, %v514_v51  ;;  %v4911_v51 = vld [vmem:[#allocation8 + $0x310] ss:$8 sps:$4 sm:$0xff]  }
 0x24d   :  { %2942 = vmatprep.subr.bf16.mxu1 %v4428_v42 }
 0x250   :  { %2943 = vmatpush1.bf16.msra.mxu1 %v4427_v61 }
 0x251   :  { %2944 = vmatprep.subr.bf16.mxu1 %v4436_v62 }
 0x254   :  { %2945 = vmatpush1.bf16.msra.mxu1 %v4435_v1 }
 0x255   :  { %2946 = vmatprep.subr.bf16.mxu1 %v4444_v2 }
 0x258   :  { %2947 = vmatpush1.bf16.msra.mxu1 %v4443_v5 }
 0x259   :  { %2948 = vmatprep.subr.bf16.mxu1 %v4452_v6  ;;  %v4860_v6 = vld [vmem:[#allocation8 + $0x200] ss:$8 sps:$4 sm:$0xff]  }
 0x25c   :  { %v5368_v14 = vpop.f32.mrb[4].mxu0  ;;  %2949 = vmatpush1.bf16.msra.mxu1 %v4451_v10  ;;  %v4863_v10 = vld [vmem:[#allocation8 + $0x210] ss:$8 sps:$4 sm:$0xff]  }
 0x25d   :  { %v2849_v17 = vpop.f32.mrb[5].mxu0  ;;  %2950 = vmatprep.subr.bf16.mxu1 %v4460_v11  ;;  %v4868_v11 = vld [vmem:[#allocation8 + $0x224] ss:$8 sps:$4 sm:$0xff]  }
 0x25e   :  { %v2851_v20 = vpop.f32.mrb[6].mxu0  ;;  %v4699_v42 = vadd.f32 %v2849_v17, %v527_v53  ;;  %v4874_v17 = vld [vmem:[#allocation8 + $0x244] ss:$8 sps:$4 sm:$0xff]  }
 0x25f   :  { %v2852_v23 = vpop.f32.mrb[7].mxu0  ;;  %v4877_v20 = vld [vmem:[#allocation8 + $0x254] ss:$8 sps:$4 sm:$0xff]   ;;  %v4959_v53 = vld [vmem:[#allocation11 + $0x8] sm:$0xff]  }
 0x260   :  { %2951 = vmatpush1.bf16.msra.mxu1 %v4459_v16  ;;  %v2982_v63 = vmax.f32 %v4699_v42, 0.0  ;;  %v4869_v16 = vld [vmem:[#allocation8 + $0x230] ss:$8 sps:$4 sm:$0xff]   ;;  %v4878_v23 = vld [vmem:[#allocation8 + $0x260] ss:$8 sps:$4 sm:$0xff]  }
 0x261   :  { %2952 = vmatprep.subr.bf16.mxu1 %v4468_v18  ;;  %v4872_v18 = vld [vmem:[#allocation8 + $0x240] ss:$8 sps:$4 sm:$0xff]   ;;  %v4919_v42 = vld [vmem:[#allocation8 + $0x334] ss:$8 sps:$4 sm:$0xff]  }
 0x262   :  { %v2990_v4 = vpack.c.bf16 %v2982_v63, %v2982_v63  ;;  %v4963_v63 = vld [vmem:[#allocation11 + $0x18] sm:$0xff]  }
 0x264   :  { %2953 = vmatpush1.bf16.msra.mxu1 %v4467_v24  ;;  %v4883_v24 = vld [vmem:[#allocation8 + $0x274] ss:$8 sps:$4 sm:$0xff]  }
 0x265   :  { %2954 = vmatprep.subr.bf16.mxu1 %v4476_v39  ;;  %v4881_v39 = vld [vmem:[#allocation8 + $0x270] ss:$8 sps:$4 sm:$0xff]  }
 0x268   :  { %2955 = vmatpush1.bf16.msra.mxu1 %v4475_v28  ;;  %v4889_v28 = vld [vmem:[#allocation8 + $0x294] ss:$8 sps:$4 sm:$0xff]  }
 0x269   :  { %2956 = vmatprep.subr.bf16.mxu1 %v4484_v30  ;;  %v4887_v30 = vld [vmem:[#allocation8 + $0x290] ss:$8 sps:$4 sm:$0xff]  }
 0x26c   :  { %2957 = vmatpush1.bf16.msra.mxu1 %v4483_v32  ;;  %v4895_v32 = vld [vmem:[#allocation8 + $0x2b4] ss:$8 sps:$4 sm:$0xff]  }
 0x26d   :  { %2958 = vmatprep.subr.bf16.mxu1 %v4492_v33  ;;  %v4893_v33 = vld [vmem:[#allocation8 + $0x2b0] ss:$8 sps:$4 sm:$0xff]  }
 0x270   :  { %2959 = vmatpush1.bf16.msra.mxu1 %v4491_v35  ;;  %v522_v35 = vsub.s32 4, %v5350_v52 }
 0x271   :  { %2960 = vmatprep.subr.bf16.mxu1 %v4500_v0  ;;  %v4901_v0 = vld [vmem:[#allocation8 + $0x2d4] ss:$8 sps:$4 sm:$0xff]  }
 0x272   :  { %v523_v40 = vrot.slane %v5353_v58, %v522_v35  ;;  %v4956_v58 = vld [vmem:[#allocation11 + $0x40] sm:$0xff]  }
 0x274   :  { %2961 = vmatpush1.bf16.msra.mxu1 %v4499_v9  ;;  %v4904_v9 = vld [vmem:[#allocation8 + $0x2e4] ss:$8 sps:$4 sm:$0xff]   ;;  %v4698_v41 = vadd.f32 %v5368_v14, %v523_v40 }
 0x275   :  { %2962 = vmatprep.subr.bf16.mxu1 %v4508_v15  ;;  %v4902_v15 = vld [vmem:[#allocation8 + $0x2e0] ss:$8 sps:$4 sm:$0xff]   ;;  %v4916_v14 = vld [vmem:[#allocation8 + $0x324] ss:$8 sps:$4 sm:$0xff]  }
 0x278   :  { %2963 = vmatpush1.bf16.msra.mxu1 %v4507_v19  ;;  %v4905_v19 = vld [vmem:[#allocation8 + $0x2f0] ss:$8 sps:$4 sm:$0xff]  }
 0x279   :  { %2964 = vmatprep.subr.bf16.mxu1 %v4516_v44  ;;  %v2981_v44 = vmax.f32 %v4698_v41, 0.0 }
 0x27c   :  { %2965 = vmatpush1.bf16.msra.mxu1 %v4515_v47  ;;  %v2989_v47 = vpack.c.bf16 %v2981_v44, %v2981_v44  ;;  %v4968_v44 = vld [vmem:[#allocation11 + $0x70] sm:$0xff]  }
 0x27d   :  { %2966 = vmatprep.subr.bf16.mxu1 %v4524_v48  ;;  %v4913_v48 = vld [vmem:[#allocation8 + $0x314] ss:$8 sps:$4 sm:$0xff]  }
 0x280   :  { %2967 = vmatpush1.bf16.msra.mxu1 %v4523_v49  ;;  %v4957_v49 = vld [vmem:[#allocation11] sm:$0xff]  }
 0x281   :  { %4670 = vmatprep.subr.bf16.mxu1 %v4956_v58 }
 0x283   :  { %2969 = vmatmul.mubr.bf16.vlgmr.msra.gmra.mrb[8].mxu1 %v5324_v27 }
 0x284   :  { %4671 = vmatpush3.bf16.msra.mxu1 %v4957_v49 }
 0x285   :  { %4672 = vmatprep.subr.bf16.mxu1 %v4958_v50 }
 0x288   :  { %4673 = vmatpush3.bf16.msra.mxu1 %v4959_v53 }
 0x289   :  { %4674 = vmatprep.subr.bf16.mxu1 %v4960_v54 }
 0x296   :  { %v2724_v60 = vpop.f32.mrb[4].mxu1 }
 0x297   :  { %v4696_v61 = vadd.f32 %v2724_v60, %v515_v55  ;;  %v2726_v62 = vpop.f32.mrb[5].mxu1  ;;  %v4914_v55 = vld [vmem:[#allocation8 + $0x320] ss:$8 sps:$4 sm:$0xff]  }
 0x298   :  { %v4697_v29 = vadd.f32 %v2726_v62, %v519_v57  ;;  %v2728_v1 = vpop.f32.mrb[6].mxu1  ;;  %v4961_v57 = vld [vmem:[#allocation11 + $0x10] sm:$0xff]   ;;  %v4962_v60 = vld [vmem:[#allocation11 + $0x58] sm:$0xff]   ;;  %v4922_v62 = vld [vmem:[#allocation8 + $0x344] ss:$8 sps:$4 sm:$0xff]  }
 0x299   :  { %v2979_v27 = vmax.f32 %v4696_v61, 0.0  ;;  %v2729_v2 = vpop.f32.mrb[7].mxu1  ;;  %v4917_v61 = vld [vmem:[#allocation8 + $0x330] ss:$8 sps:$4 sm:$0xff]   ;;  %4675 = vmatpush3.bf16.msra.mxu1 %v4961_v57  ;;  %v4920_v1 = vld [vmem:[#allocation8 + $0x340] ss:$8 sps:$4 sm:$0xff]  }
 0x29a   :  { %v2980_v3 = vmax.f32 %v4697_v29, 0.0  ;;  %4676 = vmatprep.subr.bf16.mxu1 %v4962_v60  ;;  %v4964_v29 = vld [vmem:[#allocation11 + $0x60] sm:$0xff]  }
 0x29b   :  { %v2987_v7 = vpack.c.bf16 %v2979_v27, %v2979_v27  ;;  %v4925_v27 = vld [vmem:[#allocation8 + $0x354] ss:$8 sps:$4 sm:$0xff]   ;;  %v4965_v2 = vld [vmem:[#allocation11 + $0x20] sm:$0xff]  }
 0x29c   :  { %v2988_v5 = vpack.c.bf16 %v2980_v3, %v2980_v3  ;;  %v4966_v3 = vld [vmem:[#allocation11 + $0x68] sm:$0xff]  }
 0x29d   :  { %4677 = vmatpush3.bf16.msra.mxu1 %v4963_v63  ;;  %v4653_v63 = vld [vmem:[#allocation13] ss:$0 sm:$0xff] }
 0x29e   :  { %3846 = vmatprep.mubr.bf16.mxu0 %v2988_v5  ;;  %4678 = vmatprep.subr.bf16.mxu1 %v4964_v29  ;;  %v4928_v5 = vld [vmem:[#allocation8 + $0x364] ss:$8 sps:$4 sm:$0xff]  }
 0x29f   :  { %3847 = vmatmul.mubr.bf16.vlgmr.msra.gmra.mrb[8].mxu0 %v2987_v7  ;;  %v4926_v7 = vld [vmem:[#allocation8 + $0x360] ss:$8 sps:$4 sm:$0xff]  }
 0x2a0   :  { %3856 = vmatpush1.bf16.msra.mxu0 %v4860_v6  ;;  %3887 = vmatprep.mubr.bf16.mxu0 %v2990_v4  ;;  %v4923_v4 = vld [vmem:[#allocation8 + $0x350] ss:$8 sps:$4 sm:$0xff]  }
 0x2a1   :  { %3857 = vmatprep.subr.bf16.mxu0 %v4865_v8  ;;  %4679 = vmatpush3.bf16.msra.mxu1 %v4965_v2  ;;  %v4967_v6 = vld [vmem:[#allocation11 + $0x28] sm:$0xff]   ;;  %v4931_v8 = vld [vmem:[#allocation8 + $0x374] ss:$8 sps:$4 sm:$0xff]  }
 0x2a2   :  { %4680 = vmatprep.subr.bf16.mxu1 %v4966_v3 }
 0x2a4   :  { %3858 = vmatpush1.bf16.msra.mxu0 %v4863_v10  ;;  %v4929_v10 = vld [vmem:[#allocation8 + $0x370] ss:$8 sps:$4 sm:$0xff]  }
 0x2a5   :  { %3859 = vmatprep.subr.bf16.mxu0 %v4868_v11  ;;  %4681 = vmatpush3.bf16.msra.mxu1 %v4967_v6  ;;  %v4934_v11 = vld [vmem:[#allocation8 + $0x384] ss:$8 sps:$4 sm:$0xff]  }
 0x2a6   :  { %4682 = vmatprep.subr.bf16.mxu1 %v4968_v44 }
 0x2a8   :  { %3860 = vmatpush1.bf16.msra.mxu0 %v4866_v12  ;;  %v4932_v12 = vld [vmem:[#allocation8 + $0x380] ss:$8 sps:$4 sm:$0xff]  }
 0x2a9   :  { %3861 = vmatprep.subr.bf16.mxu0 %v4871_v13  ;;  %v4937_v13 = vld [vmem:[#allocation8 + $0x394] ss:$8 sps:$4 sm:$0xff]  }
 0x2ac   :  { %3862 = vmatpush1.bf16.msra.mxu0 %v4869_v16  ;;  %v4935_v16 = vld [vmem:[#allocation8 + $0x390] ss:$8 sps:$4 sm:$0xff]  }
 0x2ad   :  { %3863 = vmatprep.subr.bf16.mxu0 %v4874_v17  ;;  %v4940_v17 = vld [vmem:[#allocation8 + $0x3a4] ss:$8 sps:$4 sm:$0xff]  }
 0x2b0   :  { %3864 = vmatpush1.bf16.msra.mxu0 %v4872_v18  ;;  %v4938_v18 = vld [vmem:[#allocation8 + $0x3a0] ss:$8 sps:$4 sm:$0xff]  }
 0x2b1   :  { %3865 = vmatprep.subr.bf16.mxu0 %v4877_v20  ;;  %v4943_v20 = vld [vmem:[#allocation8 + $0x3b4] ss:$8 sps:$4 sm:$0xff]  }
 0x2b4   :  { %3866 = vmatpush1.bf16.msra.mxu0 %v4875_v21  ;;  %v4941_v21 = vld [vmem:[#allocation8 + $0x3b0] ss:$8 sps:$4 sm:$0xff]  }
 0x2b5   :  { %3867 = vmatprep.subr.bf16.mxu0 %v4880_v22  ;;  %v4946_v22 = vld [vmem:[#allocation8 + $0x3c4] ss:$8 sps:$4 sm:$0xff]  }
 0x2b8   :  { %3868 = vmatpush1.bf16.msra.mxu0 %v4878_v23  ;;  %v4944_v23 = vld [vmem:[#allocation8 + $0x3c0] ss:$8 sps:$4 sm:$0xff]  }
 0x2b9   :  { %3869 = vmatprep.subr.bf16.mxu0 %v4883_v24  ;;  %v4949_v24 = vld [vmem:[#allocation8 + $0x3d4] ss:$8 sps:$4 sm:$0xff]  }
 0x2bc   :  { %3870 = vmatpush1.bf16.msra.mxu0 %v4881_v39  ;;  %v4947_v39 = vld [vmem:[#allocation8 + $0x3d0] ss:$8 sps:$4 sm:$0xff]  }
 0x2bd   :  { %3871 = vmatprep.subr.bf16.mxu0 %v4886_v25  ;;  %v4952_v25 = vld [vmem:[#allocation8 + $0x3e4] ss:$8 sps:$4 sm:$0xff]  }
 0x2c0   :  { %3872 = vmatpush1.bf16.msra.mxu0 %v4884_v26  ;;  %v4950_v26 = vld [vmem:[#allocation8 + $0x3e0] ss:$8 sps:$4 sm:$0xff]  }
 0x2c1   :  { %3873 = vmatprep.subr.bf16.mxu0 %v4889_v28  ;;  %v4955_v28 = vld [vmem:[#allocation8 + $0x3f4] ss:$8 sps:$4 sm:$0xff]  }
 0x2c4   :  { %3874 = vmatpush1.bf16.msra.mxu0 %v4887_v30  ;;  %v4953_v30 = vld [vmem:[#allocation8 + $0x3f0] ss:$8 sps:$4 sm:$0xff]  }
 0x2c5   :  { %3875 = vmatprep.subr.bf16.mxu0 %v4892_v31  ;;  %v530_v31 = vsub.s32 6, %v5350_v52 }
 0x2c8   :  { %3876 = vmatpush1.bf16.msra.mxu0 %v4890_v36  ;;  %v534_v36 = vsub.s32 7, %v5350_v52 }
 0x2c9   :  { %3877 = vmatprep.subr.bf16.mxu0 %v4895_v32  ;;  %v4972_v32 = vld [vmem:[#allocation7] sm:$0xff] }
 0x2cc   :  { %3878 = vmatpush1.bf16.msra.mxu0 %v4893_v33  ;;  %v531_v33 = vrot.slane %v4972_v32, %v530_v31 }
 0x2cd   :  { %3879 = vmatprep.subr.bf16.mxu0 %v4898_v37  ;;  %v535_v37 = vrot.slane %v4972_v32, %v534_v36 }
 0x2d0   :  { %3880 = vmatpush1.bf16.msra.mxu0 %v4896_v34 }
 0x2d1   :  { %3881 = vmatprep.subr.bf16.mxu0 %v4901_v0 }
 0x2d4   :  { %3882 = vmatpush1.bf16.msra.mxu0 %v4899_v38 }
 0x2d5   :  { %3883 = vmatprep.subr.bf16.mxu0 %v4904_v9 }
 0x2d8   :  { %3884 = vmatpush1.bf16.msra.mxu0 %v4902_v15 }
 0x2d9   :  { %3885 = vmatprep.subr.bf16.mxu0 %v4907_v43 }
 0x2dc   :  { %3886 = vmatpush1.bf16.msra.mxu0 %v4905_v19 }
 0x2dd   :  { %3896 = vmatprep.subr.bf16.mxu0 %v4910_v45  ;;  %v4969_v45 = vld [vmem:[#allocation11 + $0x30] sm:$0xff]  }
 0x2de   :  { %4683 = vmatpush3.bf16.msra.mxu1 %v4969_v45 }
 0x2df   :  { %3888 = vmatmul.mubr.bf16.vlgmr.msra.gmra.mrb[8].mxu0 %v2989_v47  ;;  %v4971_v47 = vld [vmem:[#allocation11 + $0x38] sm:$0xff]  }
 0x2e0   :  { %3897 = vmatpush1.bf16.msra.mxu0 %v4908_v46  ;;  %v4970_v46 = vld [vmem:[#allocation11 + $0x78] sm:$0xff]  }
 0x2e1   :  { %3898 = vmatprep.subr.bf16.mxu0 %v4913_v48  ;;  %4684 = vmatprep.subr.bf16.mxu1 %v4970_v46  ;;  %v3121_v48 = vld [vmem:[#allocation10] sm:$0x3] }
 0x2e2   :  { %4685 = vmatpush3.bf16.msra.mxu1 %v4971_v47  ;;  %v3126_v58 = vrot.slane %v3121_v48, %v506_v56  ;;  %v3130_v49 = vrot.slane %v3121_v48, %v510_v59 }
 0x2e4   :  { %3899 = vmatpush1.bf16.msra.mxu0 %v4911_v51 }
 0x2e5   :  { %3900 = vmatprep.subr.bf16.mxu0 %v4916_v14 }
 0x2e8   :  { %3901 = vmatpush1.bf16.msra.mxu0 %v4914_v55 }
 0x2e9   :  { %3902 = vmatprep.subr.bf16.mxu0 %v4919_v42 }
 0x2ec   :  { %3903 = vmatpush1.bf16.msra.mxu0 %v4917_v61 }
 0x2ed   :  { %3904 = vmatprep.subr.bf16.mxu0 %v4922_v62 }
 0x2f0   :  { %3905 = vmatpush1.bf16.msra.mxu0 %v4920_v1 }
 0x2f1   :  { %3906 = vmatprep.subr.bf16.mxu0 %v4925_v27 }
 0x2f4   :  { %3907 = vmatpush1.bf16.msra.mxu0 %v4923_v4 }
 0x2f5   :  { %3908 = vmatprep.subr.bf16.mxu0 %v4928_v5 }
 0x2f8   :  { %3909 = vmatpush1.bf16.msra.mxu0 %v4926_v7 }
 0x2f9   :  { %3910 = vmatprep.subr.bf16.mxu0 %v4931_v8 }
 0x2fc   :  { %3911 = vmatpush1.bf16.msra.mxu0 %v4929_v10 }
 0x2fd   :  { %3912 = vmatprep.subr.bf16.mxu0 %v4934_v11 }
 0x300   :  { %3913 = vmatpush1.bf16.msra.mxu0 %v4932_v12 }
 0x301   :  { %3914 = vmatprep.subr.bf16.mxu0 %v4937_v13 }
 0x304   :  { %3915 = vmatpush1.bf16.msra.mxu0 %v4935_v16 }
 0x305   :  { %3916 = vmatprep.subr.bf16.mxu0 %v4940_v17 }
 0x308   :  { %3917 = vmatpush1.bf16.msra.mxu0 %v4938_v18 }
 0x309   :  { %3918 = vmatprep.subr.bf16.mxu0 %v4943_v20 }
 0x30c   :  { %3919 = vmatpush1.bf16.msra.mxu0 %v4941_v21 }
 0x30d   :  { %3920 = vmatprep.subr.bf16.mxu0 %v4946_v22 }
 0x310   :  { %3921 = vmatpush1.bf16.msra.mxu0 %v4944_v23 }
 0x311   :  { %3922 = vmatprep.subr.bf16.mxu0 %v4949_v24 }
 0x314   :  { %3923 = vmatpush1.bf16.msra.mxu0 %v4947_v39 }
 0x315   :  { %3924 = vmatprep.subr.bf16.mxu0 %v4952_v25 }
 0x318   :  { %3925 = vmatpush1.bf16.msra.mxu0 %v4950_v26 }
 0x319   :  { %3926 = vmatprep.subr.bf16.mxu0 %v4955_v28 }
 0x31c   :  { %3927 = vmatpush1.bf16.msra.mxu0 %v4953_v30 }
 0x356   :  { %v2970_v34 = vpop.f32.mrb[8].mxu1 }
 0x357   :  { %v4700_v35 = vadd.f32 %v2970_v34, %v531_v33  ;;  %v2972_v0 = vpop.f32.mrb[9].mxu1 }
 0x358   :  { %v4701_v38 = vadd.f32 %v2972_v0, %v535_v37  ;;  %v2974_v40 = vpop.f32.mrb[10].mxu1 }
 0x359   :  { %v2983_v9 = vmax.f32 %v4700_v35, 0.0  ;;  %v2975_v15 = vpop.f32.mrb[11].mxu1 }
 0x35a   :  { %v2984_v41 = vmax.f32 %v4701_v38, 0.0 }
 0x35b   :  { %v2991_v19 = vpack.c.bf16 %v2983_v9, %v2983_v9 }
 0x35c   :  { %v2992_v43 = vpack.c.bf16 %v2984_v41, %v2984_v41 }
 0x35e   :  { %3928 = vmatprep.mubr.bf16.mxu0 %v2992_v43 }
 0x35f   :  { %3929 = vmatmul.mubr.bf16.vlgmr.msra.gmra.mrb[8].mxu0 %v2991_v19 }
 0x432   :  { %v3930_v50 = vpop.f32.mrb[8].mxu0 }
 0x433   :  { %v4702_v51 = vadd.f32 %v3930_v50, %v3126_v58  ;;  %v3932_v14 = vpop.f32.mrb[9].mxu0 }
 0x434   :  { %v4703_v53 = vadd.f32 %v3932_v14, %v3130_v49  ;;  %v3934_v54 = vpop.f32.mrb[10].mxu0 }
 0x435   :  { %v3937_v55 = vmax.f32 %v4702_v51, 0.0  ;;  %v3935_v42 = vpop.f32.mrb[11].mxu0 }
 0x436   :  { %v3938_v57 = vmax.f32 %v4703_v53, 0.0 }
 0x437   :  { %v3939_v61 = vpack.c.bf16 %v3937_v55, %v3937_v55 }
 0x438   :  { %v3940_v60 = vpack.c.bf16 %v3938_v57, %v3938_v57 }
 0x43a   :  { %4108 = vmatprep.mubr.bf16.mxu1 %v3940_v60 }
 0x43b   :  { %4109 = vmatmul.mubr.bf16.vlgmr.msra.gmra.mrb[12].mxu1 %v3939_v61 }
 0x50e   :  { %v4686_v62 = vpop.f32.mrb[12].mxu1 }
 0x50f   :  { %v4687_v29 = vpop.f32.mrb[13].mxu1 }
 0x510   :  { %v4688_v56 = vadd.f32 %v4687_v29, %v4686_v62  ;;  %v4689_v52 = vpop.f32.mrb[14].mxu1 }
 0x511   :  { %v4690_v59 = vpop.f32.mrb[15].mxu1 }
 0x512   :  { %v4111_v1 = vadd.f32 %v4688_v56, %v4653_v63 }
 0x514   :  { %4116 = vst [vmem:[#allocation14] sm:$0xff] %v4111_v1 }
 0x515   :  { %5138 = shalt.err (!%p5135_p4)
}
 0x516   :  { %s5139_s15 = scalar_lea.hbm %s5405_s7, 128 }
 0x517   :  { %p5140_p5 = scmp.ne.s32.totalorder %s5405_s7, %s5139_s15  ;;  %p5143_p6 = scmp.lt.u32.totalorder %s5139_s15, %s5405_s7 }
 0x519   :  { %p5145_p7 = pnand %p5143_p6, %p5140_p5 }
 0x51b   :  { %5148 = shalt.err (!%p5145_p7)
}
 0x51c   :  { %4126 = dma.vmem_to_hbm [thread:$0]  %s4124_s13, 128, %s5405_s7, [#allocation4]  }
 0x51d   :  { %5157 = dma.done.wait [#allocation4], 128  }
 0x51e   :  { %5158 = vsyncadd [#allocation4], 4294967168 }
 0x51f   :  { %4130 = vsyncpa [#allocation3], 1 }
 0x520   :  { %4131 = vsyncpa [#allocation6], 1 }
 0x521   :  { %4132 = vsyncpa [#allocation9], 1 }
 0x522   :  { %4133 = vsyncpa [#allocation12], 1 }
 0x523   :  { %4134 = vsyncpa [#allocation4], 1 }

</bundles_post_ra>
